<compile_context>
chip_gen: v7x
topology: tpu7x:2x2x1
jax: 0.10.0
libtpu: 0.0.40
codegen_flags: <defaults>
</compile_context>

<pallas_src>
import math
import functools

import numpy as np
import jax
import jax.numpy as jnp
from jax.experimental import pallas as pl
from jax.experimental.pallas import tpu as pltpu


# ----------------------------------------------------------------------------
# Parameter / buffer construction (deterministic, in-script)
# ----------------------------------------------------------------------------
def make_kernel_points(radius, K, dimension=3, fixed="center"):
    # TODO(synk): the original load_kernels() runs an iterative point-repulsion
    # optimization; replaced with a deterministic Fibonacci-sphere layout of
    # identical shape (K, dimension).
    n_sphere = K - 1 if fixed == "center" else K
    golden = math.pi * (3.0 - math.sqrt(5.0))
    pts = []
    for i in range(n_sphere):
        z = 1.0 - 2.0 * (i + 0.5) / max(n_sphere, 1)
        r = math.sqrt(max(0.0, 1.0 - z * z))
        th = golden * i
        pts.append([r * math.cos(th), r * math.sin(th), z])
    pts = np.asarray(pts, dtype=np.float32) * (0.66 * radius)
    if fixed == "center":
        pts = np.concatenate([np.zeros((1, dimension), np.float32), pts], axis=0)
    return pts.astype(np.float32)  # (K, 3)


def make_rotations(n_rot):
    angles = jnp.arange(n_rot, dtype=jnp.float32) / n_rot * 2.0 * jnp.pi
    c, s = jnp.cos(angles), jnp.sin(angles)
    z, o = jnp.zeros((n_rot,)), jnp.ones((n_rot,))
    rot = jnp.stack(
        [jnp.stack([c, -s, z], -1),
         jnp.stack([s, c, z], -1),
         jnp.stack([z, z, o], -1)],
        axis=-2,
    )  # (Nr, 3, 3)
    inv_rot = jnp.transpose(rot, (0, 2, 1))  # rotations -> inverse == transpose
    return rot, inv_rot


def init_params(key, K, in_channels, out_channels, radius, n_rot,
                fixed_kernel_points="center"):
    # kaiming_uniform_(a=sqrt(5)) on (K, Cin, Cout): fan_in = Cin*Cout
    fan_in = in_channels * out_channels
    bound = 1.0 / math.sqrt(fan_in)
    kernels = jax.random.uniform(
        key, (K, in_channels, out_channels), jnp.float32, -bound, bound)
    kp = jnp.asarray(make_kernel_points(radius, K, 3, fixed_kernel_points))  # (K,3)
    rot, inv_rot = make_rotations(n_rot)
    kernel_pos = jnp.einsum("rij,kj->rki", rot, kp)  # (Nr, K, 3)
    return kernels, kernel_pos, inv_rot


# ----------------------------------------------------------------------------
# Pallas kernel: one (batch b, rn-lane-tile j) block per grid step
# ----------------------------------------------------------------------------
def _kpconv_kernel(kp_ref, ker_ref, xyz_ref, feat_ref, out_ref, *,
                   inv_kp_extent, matmul_dtype):
    kp = kp_ref[...]      # (3, K, RNt)    kernel-point coords (broadcast over n)
    xyz = xyz_ref[0]      # (3, Nnb, RNt)  neighbor coords
    feat = feat_ref[0]    # (D_in, Nnb, RNt) grouped features
    K = kp.shape[1]

    # Per kernel point: linear-correlation weight (lane-dense VPU work, sqrt on
    # the EUP slot, kept f32 since v5e has no bf16 VPU/EUP) immediately
    # pre-reduced over the Nnb neighbors (sublane reduce -> XLU slot).  Only a
    # (K*D_in, RNt) slab ever reaches the MXU: no Nnb-redundant MACs, no
    # (K*D_in*Nnb, RNt) VMEM intermediate.  The static k loop bounds live
    # temporaries to (D_in, Nnb, RNt) + (Nnb, RNt).
    s_rows = []
    for k in range(K):                               # K is small (5..15): unroll
        d2 = None
        for c in range(3):
            diff = kp[c, k:k + 1, :] - xyz[c]        # (Nnb, RNt)
            d2 = diff * diff if d2 is None else d2 + diff * diff
        w_k = jnp.maximum(1.0 - jnp.sqrt(d2) * inv_kp_extent, 0.0)   # (Nnb, RNt)
        s_rows.append(jnp.sum(w_k[None, :, :] * feat, axis=1))       # (D_in, RNt)
    s = jnp.concatenate(s_rows, axis=0).astype(matmul_dtype)         # (K*D_in, RNt)

    # Single MXU matmul, lane-dense (D_out, RNt) result, full-width stores.
    out_ref[0] = jnp.dot(ker_ref[...], s,
                         preferred_element_type=jnp.float32).astype(out_ref.dtype)


def _pick_rn_tile(RN, *, bytes_per_lane, weight_bytes, max_tile, vmem_budget):
    """Largest 128-aligned tile of the flattened (Nr*Np) lane axis that divides
    RN and keeps the estimated (double-buffered) VMEM footprint under budget."""
    if RN <= 128 or RN % 128 != 0:
        # Only a full-extent block is legal when the lane axis is not 128-aligned.
        if weight_bytes + RN * bytes_per_lane > vmem_budget:
            raise ValueError(
                f"Nr*Np={RN} is not 128-aligned; the forced full-extent lane "
                f"block exceeds the VMEM budget -- pad Np to a multiple of 128.")
        return RN
    best = 128
    for t in range(256, min(RN, max_tile) + 1, 128):
        if RN % t == 0 and weight_bytes + t * bytes_per_lane <= vmem_budget:
            best = t
    return best


def kpconv_equiv_so2_forward(grouped_features, grouped_xyz, kernels, kernel_pos,
                             inv_rot_mat, kp_extent, compensate_xyz_feat=False,
                             *, matmul_dtype=jnp.bfloat16, max_rn_tile=512,
                             vmem_limit_bytes=48 * 1024 * 1024):
    """grouped_features: (B, D_in, Nr, Np, Nnb); grouped_xyz: (B, 3, Np, Nnb).
    Returns (B, D_out, Nr, Np)."""
    B, D_in, Nr, Np, Nnb = grouped_features.shape
    K, _, D_out = kernels.shape
    RN = Nr * Np
    KD = K * D_in

    if compensate_xyz_feat:
        # glue: rotate first 3 feature channels (tiny einsum, not the hot path)
        xyz_feats = grouped_features[:, :3]
        comp = jnp.einsum("rcj,bjrnm->bcrnm", inv_rot_mat, xyz_feats)
        grouped_features = jnp.concatenate([comp, grouped_features[:, 3:]], axis=1)

    # ---- layout plumbing: the flattened (Nr*Np) axis is lane-minor everywhere.
    # TODO(synk): the upstream grouping op should emit (B, D_in, Nnb, Nr*Np)
    # directly so this full HBM relayout of the dominant tensor disappears;
    # allow_input_fusion below lets XLA fuse it when this wrapper is jitted.
    feat_re = jnp.transpose(grouped_features, (0, 1, 4, 2, 3)).reshape(B, D_in, Nnb, RN)

    # Kernel-point table tiled over n (tiny: 3*K*Nr*Np floats).
    kp_t = jnp.transpose(kernel_pos, (2, 1, 0))                        # (3, K, Nr)
    kp_re = jnp.broadcast_to(kp_t[:, :, :, None], (3, K, Nr, Np)).reshape(3, K, RN)

    # Conv weights: (D_out, K*D_in) — no Nnb replication any more; bf16 operands
    # on the MXU (preferred_element_type stays f32).
    ker_t = jnp.transpose(kernels.reshape(KD, D_out), (1, 0)).astype(matmul_dtype)

    # ---- tile size from a VMEM budget (v7x: 64 MiB physical; v5e/v6e: 128 MiB)
    feat_bytes = jnp.dtype(grouped_features.dtype).itemsize
    ker_bytes = jnp.dtype(matmul_dtype).itemsize
    bytes_per_lane = (
        2 * D_in * Nnb * feat_bytes          # double-buffered feature block
        + 2 * 3 * Nnb * 4                    # xyz block
        + 2 * 3 * K * 4                      # kernel-point block
        + 2 * D_out * 4                      # output block
        + (D_in * Nnb + KD + 2 * Nnb) * 4    # in-kernel f32 temporaries
    )
    rn_tile = _pick_rn_tile(RN, bytes_per_lane=bytes_per_lane,
                            weight_bytes=D_out * KD * ker_bytes,
                            max_tile=max_rn_tile,
                            vmem_budget=int(0.8 * vmem_limit_bytes))
    n_rn = RN // rn_tile

    # ---- xyz: avoid the Nr-fold HBM broadcast whenever a lane tile stays
    # inside one rotation (the production case, Np >= rn_tile).
    if rn_tile <= Np and Np % rn_tile == 0:
        np_blocks = Np // rn_tile
        xyz_in = jnp.transpose(grouped_xyz, (0, 1, 3, 2))              # (B,3,Nnb,Np)

        def xyz_index_map(b, j):
            return (b, 0, 0, j % np_blocks)

        xyz_spec = pl.BlockSpec((1, 3, Nnb, rn_tile), xyz_index_map)
    else:
        # toy case (tile spans several rotations): broadcast is tiny, keep it.
        xyz_t = jnp.transpose(grouped_xyz, (0, 1, 3, 2))
        xyz_in = jnp.broadcast_to(xyz_t[:, :, :, None, :],
                                  (B, 3, Nnb, Nr, Np)).reshape(B, 3, Nnb, RN)
        xyz_spec = pl.BlockSpec((1, 3, Nnb, rn_tile), lambda b, j: (b, 0, 0, j))

    kernel_fn = functools.partial(_kpconv_kernel,
                                  inv_kp_extent=1.0 / float(kp_extent),
                                  matmul_dtype=matmul_dtype)
    weight_map = lambda b, j: (0, 0)

    def call(weight_spec, extra_params):
        params = dict(dimension_semantics=("parallel", "parallel"),
                      vmem_limit_bytes=int(vmem_limit_bytes))
        params.update(extra_params)
        return pl.pallas_call(
            kernel_fn,
            out_shape=jax.ShapeDtypeStruct((B, D_out, RN), jnp.float32),
            grid=(B, n_rn),
            in_specs=[
                pl.BlockSpec((3, K, rn_tile), lambda b, j: (0, 0, j)),
                weight_spec,
                xyz_spec,
                pl.BlockSpec((1, D_in, Nnb, rn_tile), lambda b, j: (b, 0, 0, j)),
            ],
            out_specs=pl.BlockSpec((1, D_out, rn_tile), lambda b, j: (b, 0, j)),
            compiler_params=pltpu.CompilerParams(**params),
        )(kp_re, ker_t, xyz_in, feat_re)

    try:
        # Tuned config: single-buffer the grid-invariant weight tile and let XLA
        # fuse the wrapper-side relayouts into the operands when jitted.
        out = call(
            pl.BlockSpec((D_out, KD), weight_map, pipeline_mode=pl.Buffered(1)),
            dict(allow_input_fusion=[False, False, True, True]),
        )
    except Exception:
        # Graceful fallback (identical math) if this JAX build rejects a knob.
        out = call(pl.BlockSpec((D_out, KD), weight_map), {})

    # (B, D_out, Nr*Np) -> (B, D_out, Nr, Np): free reshape of contiguous dims,
    # already the PyTorch output convention.
    return out.reshape(B, D_out, Nr, Np)


# ----------------------------------------------------------------------------
# Pure-JAX reference (mirrors the PyTorch forward exactly)
# ----------------------------------------------------------------------------
def kpconv_reference(grouped_features, grouped_xyz, kernels, kernel_pos,
                     inv_rot_mat, kp_extent, compensate_xyz_feat=False):
    if compensate_xyz_feat:
        xyz_feats = grouped_features[:, :3]
        comp = jnp.einsum("rcj,bjrnm->bcrnm", inv_rot_mat, xyz_feats)
        grouped_features = jnp.concatenate([comp, grouped_features[:, 3:]], axis=1)
    grouped_xyz_ = jnp.transpose(grouped_xyz, (0, 2, 3, 1))[None]      # (1,B,Np,Nnb,3)
    kp = kernel_pos[:, :, None, None, None, :]                          # (Nr,K,1,1,1,3)
    dists = jnp.sqrt(jnp.sum((kp - grouped_xyz_) ** 2, axis=-1))        # (Nr,K,B,Np,Nnb)
    weights = jnp.maximum(1.0 - dists / kp_extent, 0.0)
    return jnp.einsum("rkbnm,bdrnm,kdf->bfrn", weights, grouped_features, kernels)


# ----------------------------------------------------------------------------
if __name__ == "__main__":
    B, D_in, D_out = 2, 4, 8
    Nr, Np, Nnb = 8, 16, 8
    K = 5
    radius, kp_extent = 1.0, 0.6
    compensate_xyz_feat = False  # module default

    key = jax.random.PRNGKey(0)
    k0, k1, k2 = jax.random.split(key, 3)

    kernels, kernel_pos, inv_rot = init_params(
        k0, K, D_in, D_out, radius, Nr, fixed_kernel_points="center")
    grouped_features = jax.random.normal(k1, (B, D_in, Nr, Np, Nnb), jnp.float32)
    grouped_xyz = jax.random.normal(k2, (B, 3, Np, Nnb), jnp.float32) * 0.5

    ref = kpconv_reference(grouped_features, grouped_xyz, kernels, kernel_pos,
                           inv_rot, kp_extent, compensate_xyz_feat)

    # (1) exact-f32 MXU path: tight semantic check.
    out_f32 = jax.block_until_ready(kpconv_equiv_so2_forward(
        grouped_features, grouped_xyz, kernels, kernel_pos, inv_rot,
        kp_extent, compensate_xyz_feat, matmul_dtype=jnp.float32))
    assert out_f32.shape == (B, D_out, Nr, Np), out_f32.shape
    assert jnp.allclose(out_f32, ref, atol=2e-3, rtol=2e-3), float(
        jnp.max(jnp.abs(out_f32 - ref)))

    # (2) default bf16-operand MXU path (production config on v6e/v7x):
    #     looser tolerance only for the bf16 operand rounding.
    out_bf16 = jax.block_until_ready(kpconv_equiv_so2_forward(
        grouped_features, grouped_xyz, kernels, kernel_pos, inv_rot,
        kp_extent, compensate_xyz_feat))
    assert jnp.allclose(out_bf16, ref, atol=5e-2, rtol=5e-2), float(
        jnp.max(jnp.abs(out_bf16 - ref)))

    # (3) un-broadcast xyz path (rn_tile <= Np): exercised with a larger Np and
    #     max_rn_tile=128 so the `j % (Np // rn_tile)` index_map is non-trivial.
    Nr2, Np2 = 4, 256
    kernels2, kernel_pos2, inv_rot2 = init_params(
        k0, K, D_in, D_out, radius, Nr2, fixed_kernel_points="center")
    gf2 = jax.random.normal(k1, (B, D_in, Nr2, Np2, Nnb), jnp.float32)
    gx2 = jax.random.normal(k2, (B, 3, Np2, Nnb), jnp.float32) * 0.5
    ref2 = kpconv_reference(gf2, gx2, kernels2, kernel_pos2, inv_rot2,
                            kp_extent, False)
    out2 = jax.block_until_ready(kpconv_equiv_so2_forward(
        gf2, gx2, kernels2, kernel_pos2, inv_rot2, kp_extent, False,
        matmul_dtype=jnp.float32, max_rn_tile=128))
    assert out2.shape == (B, D_out, Nr2, Np2), out2.shape
    assert jnp.allclose(out2, ref2, atol=2e-3, rtol=2e-3), float(
        jnp.max(jnp.abs(out2 - ref2)))

    print("KERNEL_OK")
</pallas_src>

<mosaic_0001>
module attributes {stable_mosaic.version = 11 : i64} {
  func.func @_kpconv_kernel(%arg0: i32, %arg1: i32, %arg2: memref<3x5x128xf32, #tpu.memory_space<vmem>>, %arg3: memref<8x20xf32, #tpu.memory_space<vmem>>, %arg4: memref<1x3x8x128xf32, #tpu.memory_space<vmem>>, %arg5: memref<1x4x8x128xf32, #tpu.memory_space<vmem>>, %arg6: memref<1x8x128xf32, #tpu.memory_space<vmem>>) attributes {dimension_semantics = [#tpu.dimension_semantics<parallel>, #tpu.dimension_semantics<parallel>], iteration_bounds = array<i64: 2, 1>, scalar_prefetch = 0 : i64, scratch_operands = 0 : i64, tpu.core_type = #tpu.core_type<tc>, window_params = [{transform_indices = @transform_0, window_bounds = array<i64: 3, 5, 128>}, {pipeline_mode = #tpu.pipeline_mode<synchronous>, transform_indices = @transform_1, window_bounds = array<i64: 8, 20>}, {transform_indices = @transform_2, window_bounds = array<i64: 1, 3, 8, 128>}, {transform_indices = @transform_3, window_bounds = array<i64: 1, 4, 8, 128>}, {transform_indices = @transform_4, window_bounds = array<i64: 1, 8, 128>}]} {
    %c0 = arith.constant 0 : index
    %c0_0 = arith.constant 0 : index
    %c0_1 = arith.constant 0 : index
    %0 = vector.load %arg2[%c0, %c0_0, %c0_1] : memref<3x5x128xf32, #tpu.memory_space<vmem>>, vector<3x5x128xf32>
    %c0_2 = arith.constant 0 : index
    %c0_3 = arith.constant 0 : index
    %c0_4 = arith.constant 0 : index
    %c0_5 = arith.constant 0 : index
    %1 = vector.load %arg4[%c0_2, %c0_3, %c0_4, %c0_5] : memref<1x3x8x128xf32, #tpu.memory_space<vmem>>, vector<1x3x8x128xf32>
    %2 = vector.shape_cast %1 : vector<1x3x8x128xf32> to vector<3x8x128xf32>
    %c0_6 = arith.constant 0 : index
    %c0_7 = arith.constant 0 : index
    %c0_8 = arith.constant 0 : index
    %c0_9 = arith.constant 0 : index
    %3 = vector.load %arg5[%c0_6, %c0_7, %c0_8, %c0_9] : memref<1x4x8x128xf32, #tpu.memory_space<vmem>>, vector<1x4x8x128xf32>
    %4 = vector.shape_cast %3 : vector<1x4x8x128xf32> to vector<4x8x128xf32>
    %5 = vector.extract_strided_slice %0 {offsets = [0, 0, 0], sizes = [1, 1, 128], strides = [1, 1, 1]} : vector<3x5x128xf32> to vector<1x1x128xf32>
    %6 = vector.shape_cast %5 : vector<1x1x128xf32> to vector<1x128xf32>
    %7 = vector.extract_strided_slice %2 {offsets = [0, 0, 0], sizes = [1, 8, 128], strides = [1, 1, 1]} : vector<3x8x128xf32> to vector<1x8x128xf32>
    %8 = vector.shape_cast %7 : vector<1x8x128xf32> to vector<8x128xf32>
    %9 = vector.broadcast %6 : vector<1x128xf32> to vector<8x128xf32>
    %10 = arith.subf %9, %8 : vector<8x128xf32>
    %11 = arith.mulf %10, %10 : vector<8x128xf32>
    %12 = vector.extract_strided_slice %0 {offsets = [1, 0, 0], sizes = [1, 1, 128], strides = [1, 1, 1]} : vector<3x5x128xf32> to vector<1x1x128xf32>
    %13 = vector.shape_cast %12 : vector<1x1x128xf32> to vector<1x128xf32>
    %14 = vector.extract_strided_slice %2 {offsets = [1, 0, 0], sizes = [1, 8, 128], strides = [1, 1, 1]} : vector<3x8x128xf32> to vector<1x8x128xf32>
    %15 = vector.shape_cast %14 : vector<1x8x128xf32> to vector<8x128xf32>
    %16 = vector.broadcast %13 : vector<1x128xf32> to vector<8x128xf32>
    %17 = arith.subf %16, %15 : vector<8x128xf32>
    %18 = arith.mulf %17, %17 : vector<8x128xf32>
    %19 = arith.addf %11, %18 : vector<8x128xf32>
    %20 = vector.extract_strided_slice %0 {offsets = [2, 0, 0], sizes = [1, 1, 128], strides = [1, 1, 1]} : vector<3x5x128xf32> to vector<1x1x128xf32>
    %21 = vector.shape_cast %20 : vector<1x1x128xf32> to vector<1x128xf32>
    %22 = vector.extract_strided_slice %2 {offsets = [2, 0, 0], sizes = [1, 8, 128], strides = [1, 1, 1]} : vector<3x8x128xf32> to vector<1x8x128xf32>
    %23 = vector.shape_cast %22 : vector<1x8x128xf32> to vector<8x128xf32>
    %24 = vector.broadcast %21 : vector<1x128xf32> to vector<8x128xf32>
    %25 = arith.subf %24, %23 : vector<8x128xf32>
    %26 = arith.mulf %25, %25 : vector<8x128xf32>
    %27 = arith.addf %19, %26 : vector<8x128xf32>
    %28 = math.sqrt %27 : vector<8x128xf32>
    %cst = arith.constant 1.66666663 : f32
    %29 = vector.broadcast %cst : f32 to vector<8x128xf32>
    %30 = arith.mulf %28, %29 : vector<8x128xf32>
    %cst_10 = arith.constant 1.000000e+00 : f32
    %31 = vector.broadcast %cst_10 : f32 to vector<8x128xf32>
    %32 = arith.subf %31, %30 : vector<8x128xf32>
    %cst_11 = arith.constant 0.000000e+00 : f32
    %33 = vector.broadcast %cst_11 : f32 to vector<8x128xf32>
    %34 = arith.maximumf %32, %33 : vector<8x128xf32>
    %35 = vector.shape_cast %34 : vector<8x128xf32> to vector<1x8x128xf32>
    %36 = vector.broadcast %35 : vector<1x8x128xf32> to vector<4x8x128xf32>
    %37 = arith.mulf %36, %4 : vector<4x8x128xf32>
    %cst_12 = arith.constant dense<0.000000e+00> : vector<4x128xf32>
    %38 = vector.multi_reduction <add>, %37, %cst_12 [1] : vector<4x8x128xf32> to vector<4x128xf32>
    %39 = vector.extract_strided_slice %0 {offsets = [0, 1, 0], sizes = [1, 1, 128], strides = [1, 1, 1]} : vector<3x5x128xf32> to vector<1x1x128xf32>
    %40 = vector.shape_cast %39 : vector<1x1x128xf32> to vector<1x128xf32>
    %41 = vector.extract_strided_slice %2 {offsets = [0, 0, 0], sizes = [1, 8, 128], strides = [1, 1, 1]} : vector<3x8x128xf32> to vector<1x8x128xf32>
    %42 = vector.shape_cast %41 : vector<1x8x128xf32> to vector<8x128xf32>
    %43 = vector.broadcast %40 : vector<1x128xf32> to vector<8x128xf32>
    %44 = arith.subf %43, %42 : vector<8x128xf32>
    %45 = arith.mulf %44, %44 : vector<8x128xf32>
    %46 = vector.extract_strided_slice %0 {offsets = [1, 1, 0], sizes = [1, 1, 128], strides = [1, 1, 1]} : vector<3x5x128xf32> to vector<1x1x128xf32>
    %47 = vector.shape_cast %46 : vector<1x1x128xf32> to vector<1x128xf32>
    %48 = vector.extract_strided_slice %2 {offsets = [1, 0, 0], sizes = [1, 8, 128], strides = [1, 1, 1]} : vector<3x8x128xf32> to vector<1x8x128xf32>
    %49 = vector.shape_cast %48 : vector<1x8x128xf32> to vector<8x128xf32>
    %50 = vector.broadcast %47 : vector<1x128xf32> to vector<8x128xf32>
    %51 = arith.subf %50, %49 : vector<8x128xf32>
    %52 = arith.mulf %51, %51 : vector<8x128xf32>
    %53 = arith.addf %45, %52 : vector<8x128xf32>
    %54 = vector.extract_strided_slice %0 {offsets = [2, 1, 0], sizes = [1, 1, 128], strides = [1, 1, 1]} : vector<3x5x128xf32> to vector<1x1x128xf32>
    %55 = vector.shape_cast %54 : vector<1x1x128xf32> to vector<1x128xf32>
    %56 = vector.extract_strided_slice %2 {offsets = [2, 0, 0], sizes = [1, 8, 128], strides = [1, 1, 1]} : vector<3x8x128xf32> to vector<1x8x128xf32>
    %57 = vector.shape_cast %56 : vector<1x8x128xf32> to vector<8x128xf32>
    %58 = vector.broadcast %55 : vector<1x128xf32> to vector<8x128xf32>
    %59 = arith.subf %58, %57 : vector<8x128xf32>
    %60 = arith.mulf %59, %59 : vector<8x128xf32>
    %61 = arith.addf %53, %60 : vector<8x128xf32>
    %62 = math.sqrt %61 : vector<8x128xf32>
    %cst_13 = arith.constant 1.66666663 : f32
    %63 = vector.broadcast %cst_13 : f32 to vector<8x128xf32>
    %64 = arith.mulf %62, %63 : vector<8x128xf32>
    %cst_14 = arith.constant 1.000000e+00 : f32
    %65 = vector.broadcast %cst_14 : f32 to vector<8x128xf32>
    %66 = arith.subf %65, %64 : vector<8x128xf32>
    %cst_15 = arith.constant 0.000000e+00 : f32
    %67 = vector.broadcast %cst_15 : f32 to vector<8x128xf32>
    %68 = arith.maximumf %66, %67 : vector<8x128xf32>
    %69 = vector.shape_cast %68 : vector<8x128xf32> to vector<1x8x128xf32>
    %70 = vector.broadcast %69 : vector<1x8x128xf32> to vector<4x8x128xf32>
    %71 = arith.mulf %70, %4 : vector<4x8x128xf32>
    %cst_16 = arith.constant dense<0.000000e+00> : vector<4x128xf32>
    %72 = vector.multi_reduction <add>, %71, %cst_16 [1] : vector<4x8x128xf32> to vector<4x128xf32>
    %73 = vector.extract_strided_slice %0 {offsets = [0, 2, 0], sizes = [1, 1, 128], strides = [1, 1, 1]} : vector<3x5x128xf32> to vector<1x1x128xf32>
    %74 = vector.shape_cast %73 : vector<1x1x128xf32> to vector<1x128xf32>
    %75 = vector.extract_strided_slice %2 {offsets = [0, 0, 0], sizes = [1, 8, 128], strides = [1, 1, 1]} : vector<3x8x128xf32> to vector<1x8x128xf32>
    %76 = vector.shape_cast %75 : vector<1x8x128xf32> to vector<8x128xf32>
    %77 = vector.broadcast %74 : vector<1x128xf32> to vector<8x128xf32>
    %78 = arith.subf %77, %76 : vector<8x128xf32>
    %79 = arith.mulf %78, %78 : vector<8x128xf32>
    %80 = vector.extract_strided_slice %0 {offsets = [1, 2, 0], sizes = [1, 1, 128], strides = [1, 1, 1]} : vector<3x5x128xf32> to vector<1x1x128xf32>
    %81 = vector.shape_cast %80 : vector<1x1x128xf32> to vector<1x128xf32>
    %82 = vector.extract_strided_slice %2 {offsets = [1, 0, 0], sizes = [1, 8, 128], strides = [1, 1, 1]} : vector<3x8x128xf32> to vector<1x8x128xf32>
    %83 = vector.shape_cast %82 : vector<1x8x128xf32> to vector<8x128xf32>
    %84 = vector.broadcast %81 : vector<1x128xf32> to vector<8x128xf32>
    %85 = arith.subf %84, %83 : vector<8x128xf32>
    %86 = arith.mulf %85, %85 : vector<8x128xf32>
    %87 = arith.addf %79, %86 : vector<8x128xf32>
    %88 = vector.extract_strided_slice %0 {offsets = [2, 2, 0], sizes = [1, 1, 128], strides = [1, 1, 1]} : vector<3x5x128xf32> to vector<1x1x128xf32>
    %89 = vector.shape_cast %88 : vector<1x1x128xf32> to vector<1x128xf32>
    %90 = vector.extract_strided_slice %2 {offsets = [2, 0, 0], sizes = [1, 8, 128], strides = [1, 1, 1]} : vector<3x8x128xf32> to vector<1x8x128xf32>
    %91 = vector.shape_cast %90 : vector<1x8x128xf32> to vector<8x128xf32>
    %92 = vector.broadcast %89 : vector<1x128xf32> to vector<8x128xf32>
    %93 = arith.subf %92, %91 : vector<8x128xf32>
    %94 = arith.mulf %93, %93 : vector<8x128xf32>
    %95 = arith.addf %87, %94 : vector<8x128xf32>
    %96 = math.sqrt %95 : vector<8x128xf32>
    %cst_17 = arith.constant 1.66666663 : f32
    %97 = vector.broadcast %cst_17 : f32 to vector<8x128xf32>
    %98 = arith.mulf %96, %97 : vector<8x128xf32>
    %cst_18 = arith.constant 1.000000e+00 : f32
    %99 = vector.broadcast %cst_18 : f32 to vector<8x128xf32>
    %100 = arith.subf %99, %98 : vector<8x128xf32>
    %cst_19 = arith.constant 0.000000e+00 : f32
    %101 = vector.broadcast %cst_19 : f32 to vector<8x128xf32>
    %102 = arith.maximumf %100, %101 : vector<8x128xf32>
    %103 = vector.shape_cast %102 : vector<8x128xf32> to vector<1x8x128xf32>
    %104 = vector.broadcast %103 : vector<1x8x128xf32> to vector<4x8x128xf32>
    %105 = arith.mulf %104, %4 : vector<4x8x128xf32>
    %cst_20 = arith.constant dense<0.000000e+00> : vector<4x128xf32>
    %106 = vector.multi_reduction <add>, %105, %cst_20 [1] : vector<4x8x128xf32> to vector<4x128xf32>
    %107 = vector.extract_strided_slice %0 {offsets = [0, 3, 0], sizes = [1, 1, 128], strides = [1, 1, 1]} : vector<3x5x128xf32> to vector<1x1x128xf32>
    %108 = vector.shape_cast %107 : vector<1x1x128xf32> to vector<1x128xf32>
    %109 = vector.extract_strided_slice %2 {offsets = [0, 0, 0], sizes = [1, 8, 128], strides = [1, 1, 1]} : vector<3x8x128xf32> to vector<1x8x128xf32>
    %110 = vector.shape_cast %109 : vector<1x8x128xf32> to vector<8x128xf32>
    %111 = vector.broadcast %108 : vector<1x128xf32> to vector<8x128xf32>
    %112 = arith.subf %111, %110 : vector<8x128xf32>
    %113 = arith.mulf %112, %112 : vector<8x128xf32>
    %114 = vector.extract_strided_slice %0 {offsets = [1, 3, 0], sizes = [1, 1, 128], strides = [1, 1, 1]} : vector<3x5x128xf32> to vector<1x1x128xf32>
    %115 = vector.shape_cast %114 : vector<1x1x128xf32> to vector<1x128xf32>
    %116 = vector.extract_strided_slice %2 {offsets = [1, 0, 0], sizes = [1, 8, 128], strides = [1, 1, 1]} : vector<3x8x128xf32> to vector<1x8x128xf32>
    %117 = vector.shape_cast %116 : vector<1x8x128xf32> to vector<8x128xf32>
    %118 = vector.broadcast %115 : vector<1x128xf32> to vector<8x128xf32>
    %119 = arith.subf %118, %117 : vector<8x128xf32>
    %120 = arith.mulf %119, %119 : vector<8x128xf32>
    %121 = arith.addf %113, %120 : vector<8x128xf32>
    %122 = vector.extract_strided_slice %0 {offsets = [2, 3, 0], sizes = [1, 1, 128], strides = [1, 1, 1]} : vector<3x5x128xf32> to vector<1x1x128xf32>
    %123 = vector.shape_cast %122 : vector<1x1x128xf32> to vector<1x128xf32>
    %124 = vector.extract_strided_slice %2 {offsets = [2, 0, 0], sizes = [1, 8, 128], strides = [1, 1, 1]} : vector<3x8x128xf32> to vector<1x8x128xf32>
    %125 = vector.shape_cast %124 : vector<1x8x128xf32> to vector<8x128xf32>
    %126 = vector.broadcast %123 : vector<1x128xf32> to vector<8x128xf32>
    %127 = arith.subf %126, %125 : vector<8x128xf32>
    %128 = arith.mulf %127, %127 : vector<8x128xf32>
    %129 = arith.addf %121, %128 : vector<8x128xf32>
    %130 = math.sqrt %129 : vector<8x128xf32>
    %cst_21 = arith.constant 1.66666663 : f32
    %131 = vector.broadcast %cst_21 : f32 to vector<8x128xf32>
    %132 = arith.mulf %130, %131 : vector<8x128xf32>
    %cst_22 = arith.constant 1.000000e+00 : f32
    %133 = vector.broadcast %cst_22 : f32 to vector<8x128xf32>
    %134 = arith.subf %133, %132 : vector<8x128xf32>
    %cst_23 = arith.constant 0.000000e+00 : f32
    %135 = vector.broadcast %cst_23 : f32 to vector<8x128xf32>
    %136 = arith.maximumf %134, %135 : vector<8x128xf32>
    %137 = vector.shape_cast %136 : vector<8x128xf32> to vector<1x8x128xf32>
    %138 = vector.broadcast %137 : vector<1x8x128xf32> to vector<4x8x128xf32>
    %139 = arith.mulf %138, %4 : vector<4x8x128xf32>
    %cst_24 = arith.constant dense<0.000000e+00> : vector<4x128xf32>
    %140 = vector.multi_reduction <add>, %139, %cst_24 [1] : vector<4x8x128xf32> to vector<4x128xf32>
    %141 = vector.extract_strided_slice %0 {offsets = [0, 4, 0], sizes = [1, 1, 128], strides = [1, 1, 1]} : vector<3x5x128xf32> to vector<1x1x128xf32>
    %142 = vector.shape_cast %141 : vector<1x1x128xf32> to vector<1x128xf32>
    %143 = vector.extract_strided_slice %2 {offsets = [0, 0, 0], sizes = [1, 8, 128], strides = [1, 1, 1]} : vector<3x8x128xf32> to vector<1x8x128xf32>
    %144 = vector.shape_cast %143 : vector<1x8x128xf32> to vector<8x128xf32>
    %145 = vector.broadcast %142 : vector<1x128xf32> to vector<8x128xf32>
    %146 = arith.subf %145, %144 : vector<8x128xf32>
    %147 = arith.mulf %146, %146 : vector<8x128xf32>
    %148 = vector.extract_strided_slice %0 {offsets = [1, 4, 0], sizes = [1, 1, 128], strides = [1, 1, 1]} : vector<3x5x128xf32> to vector<1x1x128xf32>
    %149 = vector.shape_cast %148 : vector<1x1x128xf32> to vector<1x128xf32>
    %150 = vector.extract_strided_slice %2 {offsets = [1, 0, 0], sizes = [1, 8, 128], strides = [1, 1, 1]} : vector<3x8x128xf32> to vector<1x8x128xf32>
    %151 = vector.shape_cast %150 : vector<1x8x128xf32> to vector<8x128xf32>
    %152 = vector.broadcast %149 : vector<1x128xf32> to vector<8x128xf32>
    %153 = arith.subf %152, %151 : vector<8x128xf32>
    %154 = arith.mulf %153, %153 : vector<8x128xf32>
    %155 = arith.addf %147, %154 : vector<8x128xf32>
    %156 = vector.extract_strided_slice %0 {offsets = [2, 4, 0], sizes = [1, 1, 128], strides = [1, 1, 1]} : vector<3x5x128xf32> to vector<1x1x128xf32>
    %157 = vector.shape_cast %156 : vector<1x1x128xf32> to vector<1x128xf32>
    %158 = vector.extract_strided_slice %2 {offsets = [2, 0, 0], sizes = [1, 8, 128], strides = [1, 1, 1]} : vector<3x8x128xf32> to vector<1x8x128xf32>
    %159 = vector.shape_cast %158 : vector<1x8x128xf32> to vector<8x128xf32>
    %160 = vector.broadcast %157 : vector<1x128xf32> to vector<8x128xf32>
    %161 = arith.subf %160, %159 : vector<8x128xf32>
    %162 = arith.mulf %161, %161 : vector<8x128xf32>
    %163 = arith.addf %155, %162 : vector<8x128xf32>
    %164 = math.sqrt %163 : vector<8x128xf32>
    %cst_25 = arith.constant 1.66666663 : f32
    %165 = vector.broadcast %cst_25 : f32 to vector<8x128xf32>
    %166 = arith.mulf %164, %165 : vector<8x128xf32>
    %cst_26 = arith.constant 1.000000e+00 : f32
    %167 = vector.broadcast %cst_26 : f32 to vector<8x128xf32>
    %168 = arith.subf %167, %166 : vector<8x128xf32>
    %cst_27 = arith.constant 0.000000e+00 : f32
    %169 = vector.broadcast %cst_27 : f32 to vector<8x128xf32>
    %170 = arith.maximumf %168, %169 : vector<8x128xf32>
    %171 = vector.shape_cast %170 : vector<8x128xf32> to vector<1x8x128xf32>
    %172 = vector.broadcast %171 : vector<1x8x128xf32> to vector<4x8x128xf32>
    %173 = arith.mulf %172, %4 : vector<4x8x128xf32>
    %cst_28 = arith.constant dense<0.000000e+00> : vector<4x128xf32>
    %174 = vector.multi_reduction <add>, %173, %cst_28 [1] : vector<4x8x128xf32> to vector<4x128xf32>
    %175 = tpu.concatenate %38, %72, %106, %140, %174 in 0 : vector<4x128xf32>, vector<4x128xf32>, vector<4x128xf32>, vector<4x128xf32>, vector<4x128xf32> -> vector<20x128xf32>
    %c0_29 = arith.constant 0 : index
    %c0_30 = arith.constant 0 : index
    %176 = vector.load %arg3[%c0_29, %c0_30] : memref<8x20xf32, #tpu.memory_space<vmem>>, vector<8x20xf32>
    %cst_31 = arith.constant dense<0.000000e+00> : vector<8x128xf32>
    %177 = tpu.matmul %176, %175, %cst_31 {dimension_numbers = #tpu.dot_dimension_numbers<[1], [0], [0], [1], [0, 0, 1, 1], [], []>} : vector<8x20xf32>, vector<20x128xf32>, vector<8x128xf32> -> vector<8x128xf32>
    %c0_32 = arith.constant 0 : index
    %c0_33 = arith.constant 0 : index
    %c0_34 = arith.constant 0 : index
    %178 = vector.load %arg6[%c0_32, %c0_33, %c0_34] : memref<1x8x128xf32, #tpu.memory_space<vmem>>, vector<1x8x128xf32>
    %179 = vector.shape_cast %178 : vector<1x8x128xf32> to vector<8x128xf32>
    %180 = vector.shape_cast %177 : vector<8x128xf32> to vector<1x8x128xf32>
    tpu.vector_store %arg6[%c0_32, %c0_33, %c0_34], %180 {strides = array<i32>} : memref<1x8x128xf32, #tpu.memory_space<vmem>>, vector<1x8x128xf32>,
    return
  }
  func.func @transform_0(%arg0: i32, %arg1: i32) -> (i32, i32, i32) {
    %c0_i32 = arith.constant 0 : i32
    %c0_i32_0 = arith.constant 0 : i32
    %c0_i32_1 = arith.constant 0 : i32
    return %c0_i32, %c0_i32_0, %arg1 : i32, i32, i32
  }
  func.func @transform_1(%arg0: i32, %arg1: i32) -> (i32, i32) {
    %c0_i32 = arith.constant 0 : i32
    %c0_i32_0 = arith.constant 0 : i32
    %c0_i32_1 = arith.constant 0 : i32
    return %c0_i32, %c0_i32_0 : i32, i32
  }
  func.func @transform_2(%arg0: i32, %arg1: i32) -> (i32, i32, i32, i32) {
    %c0_i32 = arith.constant 0 : i32
    %c0_i32_0 = arith.constant 0 : i32
    %c0_i32_1 = arith.constant 0 : i32
    return %arg0, %c0_i32, %c0_i32_0, %arg1 : i32, i32, i32, i32
  }
  func.func @transform_3(%arg0: i32, %arg1: i32) -> (i32, i32, i32, i32) {
    %c0_i32 = arith.constant 0 : i32
    %c0_i32_0 = arith.constant 0 : i32
    %c0_i32_1 = arith.constant 0 : i32
    return %arg0, %c0_i32, %c0_i32_0, %arg1 : i32, i32, i32, i32
  }
  func.func @transform_4(%arg0: i32, %arg1: i32) -> (i32, i32, i32) {
    %c0_i32 = arith.constant 0 : i32
    %c0_i32_0 = arith.constant 0 : i32
    return %arg0, %c0_i32, %arg1 : i32, i32, i32
  }
}

module attributes {stable_mosaic.version = 11 : i64} {
  func.func @_kpconv_kernel(%arg0: i32, %arg1: i32, %arg2: memref<3x5x128xf32, #tpu.memory_space<vmem>>, %arg3: memref<8x20xf32, #tpu.memory_space<vmem>>, %arg4: memref<1x3x8x128xf32, #tpu.memory_space<vmem>>, %arg5: memref<1x4x8x128xf32, #tpu.memory_space<vmem>>, %arg6: memref<1x8x128xf32, #tpu.memory_space<vmem>>) attributes {dimension_semantics = [#tpu.dimension_semantics<parallel>, #tpu.dimension_semantics<parallel>], iteration_bounds = array<i64: 2, 1>, scalar_prefetch = 0 : i64, scratch_operands = 0 : i64, tpu.core_type = #tpu.core_type<tc>, window_params = [{transform_indices = @transform_0, window_bounds = array<i64: 3, 5, 128>}, {pipeline_mode = #tpu.pipeline_mode<synchronous>, transform_indices = @transform_1, window_bounds = array<i64: 8, 20>}, {transform_indices = @transform_2, window_bounds = array<i64: 1, 3, 8, 128>}, {transform_indices = @transform_3, window_bounds = array<i64: 1, 4, 8, 128>}, {transform_indices = @transform_4, window_bounds = array<i64: 1, 8, 128>}]} {
    %c0 = arith.constant 0 : index
    %c0_0 = arith.constant 0 : index
    %c0_1 = arith.constant 0 : index
    %0 = vector.load %arg2[%c0, %c0_0, %c0_1] : memref<3x5x128xf32, #tpu.memory_space<vmem>>, vector<3x5x128xf32>
    %c0_2 = arith.constant 0 : index
    %c0_3 = arith.constant 0 : index
    %c0_4 = arith.constant 0 : index
    %c0_5 = arith.constant 0 : index
    %1 = vector.load %arg4[%c0_2, %c0_3, %c0_4, %c0_5] : memref<1x3x8x128xf32, #tpu.memory_space<vmem>>, vector<1x3x8x128xf32>
    %2 = vector.shape_cast %1 : vector<1x3x8x128xf32> to vector<3x8x128xf32>
    %c0_6 = arith.constant 0 : index
    %c0_7 = arith.constant 0 : index
    %c0_8 = arith.constant 0 : index
    %c0_9 = arith.constant 0 : index
    %3 = vector.load %arg5[%c0_6, %c0_7, %c0_8, %c0_9] : memref<1x4x8x128xf32, #tpu.memory_space<vmem>>, vector<1x4x8x128xf32>
    %4 = vector.shape_cast %3 : vector<1x4x8x128xf32> to vector<4x8x128xf32>
    %5 = vector.extract_strided_slice %0 {offsets = [0, 0, 0], sizes = [1, 1, 128], strides = [1, 1, 1]} : vector<3x5x128xf32> to vector<1x1x128xf32>
    %6 = vector.shape_cast %5 : vector<1x1x128xf32> to vector<1x128xf32>
    %7 = vector.extract_strided_slice %2 {offsets = [0, 0, 0], sizes = [1, 8, 128], strides = [1, 1, 1]} : vector<3x8x128xf32> to vector<1x8x128xf32>
    %8 = vector.shape_cast %7 : vector<1x8x128xf32> to vector<8x128xf32>
    %9 = vector.broadcast %6 : vector<1x128xf32> to vector<8x128xf32>
    %10 = arith.subf %9, %8 : vector<8x128xf32>
    %11 = arith.mulf %10, %10 : vector<8x128xf32>
    %12 = vector.extract_strided_slice %0 {offsets = [1, 0, 0], sizes = [1, 1, 128], strides = [1, 1, 1]} : vector<3x5x128xf32> to vector<1x1x128xf32>
    %13 = vector.shape_cast %12 : vector<1x1x128xf32> to vector<1x128xf32>
    %14 = vector.extract_strided_slice %2 {offsets = [1, 0, 0], sizes = [1, 8, 128], strides = [1, 1, 1]} : vector<3x8x128xf32> to vector<1x8x128xf32>
    %15 = vector.shape_cast %14 : vector<1x8x128xf32> to vector<8x128xf32>
    %16 = vector.broadcast %13 : vector<1x128xf32> to vector<8x128xf32>
    %17 = arith.subf %16, %15 : vector<8x128xf32>
    %18 = arith.mulf %17, %17 : vector<8x128xf32>
    %19 = arith.addf %11, %18 : vector<8x128xf32>
    %20 = vector.extract_strided_slice %0 {offsets = [2, 0, 0], sizes = [1, 1, 128], strides = [1, 1, 1]} : vector<3x5x128xf32> to vector<1x1x128xf32>
    %21 = vector.shape_cast %20 : vector<1x1x128xf32> to vector<1x128xf32>
    %22 = vector.extract_strided_slice %2 {offsets = [2, 0, 0], sizes = [1, 8, 128], strides = [1, 1, 1]} : vector<3x8x128xf32> to vector<1x8x128xf32>
    %23 = vector.shape_cast %22 : vector<1x8x128xf32> to vector<8x128xf32>
    %24 = vector.broadcast %21 : vector<1x128xf32> to vector<8x128xf32>
    %25 = arith.subf %24, %23 : vector<8x128xf32>
    %26 = arith.mulf %25, %25 : vector<8x128xf32>
    %27 = arith.addf %19, %26 : vector<8x128xf32>
    %28 = math.sqrt %27 : vector<8x128xf32>
    %cst = arith.constant 1.66666663 : f32
    %29 = vector.broadcast %cst : f32 to vector<8x128xf32>
    %30 = arith.mulf %28, %29 : vector<8x128xf32>
    %cst_10 = arith.constant 1.000000e+00 : f32
    %31 = vector.broadcast %cst_10 : f32 to vector<8x128xf32>
    %32 = arith.subf %31, %30 : vector<8x128xf32>
    %cst_11 = arith.constant 0.000000e+00 : f32
    %33 = vector.broadcast %cst_11 : f32 to vector<8x128xf32>
    %34 = arith.maximumf %32, %33 : vector<8x128xf32>
    %35 = vector.shape_cast %34 : vector<8x128xf32> to vector<1x8x128xf32>
    %36 = vector.broadcast %35 : vector<1x8x128xf32> to vector<4x8x128xf32>
    %37 = arith.mulf %36, %4 : vector<4x8x128xf32>
    %cst_12 = arith.constant dense<0.000000e+00> : vector<4x128xf32>
    %38 = vector.multi_reduction <add>, %37, %cst_12 [1] : vector<4x8x128xf32> to vector<4x128xf32>
    %39 = vector.extract_strided_slice %0 {offsets = [0, 1, 0], sizes = [1, 1, 128], strides = [1, 1, 1]} : vector<3x5x128xf32> to vector<1x1x128xf32>
    %40 = vector.shape_cast %39 : vector<1x1x128xf32> to vector<1x128xf32>
    %41 = vector.extract_strided_slice %2 {offsets = [0, 0, 0], sizes = [1, 8, 128], strides = [1, 1, 1]} : vector<3x8x128xf32> to vector<1x8x128xf32>
    %42 = vector.shape_cast %41 : vector<1x8x128xf32> to vector<8x128xf32>
    %43 = vector.broadcast %40 : vector<1x128xf32> to vector<8x128xf32>
    %44 = arith.subf %43, %42 : vector<8x128xf32>
    %45 = arith.mulf %44, %44 : vector<8x128xf32>
    %46 = vector.extract_strided_slice %0 {offsets = [1, 1, 0], sizes = [1, 1, 128], strides = [1, 1, 1]} : vector<3x5x128xf32> to vector<1x1x128xf32>
    %47 = vector.shape_cast %46 : vector<1x1x128xf32> to vector<1x128xf32>
    %48 = vector.extract_strided_slice %2 {offsets = [1, 0, 0], sizes = [1, 8, 128], strides = [1, 1, 1]} : vector<3x8x128xf32> to vector<1x8x128xf32>
    %49 = vector.shape_cast %48 : vector<1x8x128xf32> to vector<8x128xf32>
    %50 = vector.broadcast %47 : vector<1x128xf32> to vector<8x128xf32>
    %51 = arith.subf %50, %49 : vector<8x128xf32>
    %52 = arith.mulf %51, %51 : vector<8x128xf32>
    %53 = arith.addf %45, %52 : vector<8x128xf32>
    %54 = vector.extract_strided_slice %0 {offsets = [2, 1, 0], sizes = [1, 1, 128], strides = [1, 1, 1]} : vector<3x5x128xf32> to vector<1x1x128xf32>
    %55 = vector.shape_cast %54 : vector<1x1x128xf32> to vector<1x128xf32>
    %56 = vector.extract_strided_slice %2 {offsets = [2, 0, 0], sizes = [1, 8, 128], strides = [1, 1, 1]} : vector<3x8x128xf32> to vector<1x8x128xf32>
    %57 = vector.shape_cast %56 : vector<1x8x128xf32> to vector<8x128xf32>
    %58 = vector.broadcast %55 : vector<1x128xf32> to vector<8x128xf32>
    %59 = arith.subf %58, %57 : vector<8x128xf32>
    %60 = arith.mulf %59, %59 : vector<8x128xf32>
    %61 = arith.addf %53, %60 : vector<8x128xf32>
    %62 = math.sqrt %61 : vector<8x128xf32>
    %cst_13 = arith.constant 1.66666663 : f32
    %63 = vector.broadcast %cst_13 : f32 to vector<8x128xf32>
    %64 = arith.mulf %62, %63 : vector<8x128xf32>
    %cst_14 = arith.constant 1.000000e+00 : f32
    %65 = vector.broadcast %cst_14 : f32 to vector<8x128xf32>
    %66 = arith.subf %65, %64 : vector<8x128xf32>
    %cst_15 = arith.constant 0.000000e+00 : f32
    %67 = vector.broadcast %cst_15 : f32 to vector<8x128xf32>
    %68 = arith.maximumf %66, %67 : vector<8x128xf32>
    %69 = vector.shape_cast %68 : vector<8x128xf32> to vector<1x8x128xf32>
    %70 = vector.broadcast %69 : vector<1x8x128xf32> to vector<4x8x128xf32>
    %71 = arith.mulf %70, %4 : vector<4x8x128xf32>
    %cst_16 = arith.constant dense<0.000000e+00> : vector<4x128xf32>
    %72 = vector.multi_reduction <add>, %71, %cst_16 [1] : vector<4x8x128xf32> to vector<4x128xf32>
    %73 = vector.extract_strided_slice %0 {offsets = [0, 2, 0], sizes = [1, 1, 128], strides = [1, 1, 1]} : vector<3x5x128xf32> to vector<1x1x128xf32>
    %74 = vector.shape_cast %73 : vector<1x1x128xf32> to vector<1x128xf32>
    %75 = vector.extract_strided_slice %2 {offsets = [0, 0, 0], sizes = [1, 8, 128], strides = [1, 1, 1]} : vector<3x8x128xf32> to vector<1x8x128xf32>
    %76 = vector.shape_cast %75 : vector<1x8x128xf32> to vector<8x128xf32>
    %77 = vector.broadcast %74 : vector<1x128xf32> to vector<8x128xf32>
    %78 = arith.subf %77, %76 : vector<8x128xf32>
    %79 = arith.mulf %78, %78 : vector<8x128xf32>
    %80 = vector.extract_strided_slice %0 {offsets = [1, 2, 0], sizes = [1, 1, 128], strides = [1, 1, 1]} : vector<3x5x128xf32> to vector<1x1x128xf32>
    %81 = vector.shape_cast %80 : vector<1x1x128xf32> to vector<1x128xf32>
    %82 = vector.extract_strided_slice %2 {offsets = [1, 0, 0], sizes = [1, 8, 128], strides = [1, 1, 1]} : vector<3x8x128xf32> to vector<1x8x128xf32>
    %83 = vector.shape_cast %82 : vector<1x8x128xf32> to vector<8x128xf32>
    %84 = vector.broadcast %81 : vector<1x128xf32> to vector<8x128xf32>
    %85 = arith.subf %84, %83 : vector<8x128xf32>
    %86 = arith.mulf %85, %85 : vector<8x128xf32>
    %87 = arith.addf %79, %86 : vector<8x128xf32>
    %88 = vector.extract_strided_slice %0 {offsets = [2, 2, 0], sizes = [1, 1, 128], strides = [1, 1, 1]} : vector<3x5x128xf32> to vector<1x1x128xf32>
    %89 = vector.shape_cast %88 : vector<1x1x128xf32> to vector<1x128xf32>
    %90 = vector.extract_strided_slice %2 {offsets = [2, 0, 0], sizes = [1, 8, 128], strides = [1, 1, 1]} : vector<3x8x128xf32> to vector<1x8x128xf32>
    %91 = vector.shape_cast %90 : vector<1x8x128xf32> to vector<8x128xf32>
    %92 = vector.broadcast %89 : vector<1x128xf32> to vector<8x128xf32>
    %93 = arith.subf %92, %91 : vector<8x128xf32>
    %94 = arith.mulf %93, %93 : vector<8x128xf32>
    %95 = arith.addf %87, %94 : vector<8x128xf32>
    %96 = math.sqrt %95 : vector<8x128xf32>
    %cst_17 = arith.constant 1.66666663 : f32
    %97 = vector.broadcast %cst_17 : f32 to vector<8x128xf32>
    %98 = arith.mulf %96, %97 : vector<8x128xf32>
    %cst_18 = arith.constant 1.000000e+00 : f32
    %99 = vector.broadcast %cst_18 : f32 to vector<8x128xf32>
    %100 = arith.subf %99, %98 : vector<8x128xf32>
    %cst_19 = arith.constant 0.000000e+00 : f32
    %101 = vector.broadcast %cst_19 : f32 to vector<8x128xf32>
    %102 = arith.maximumf %100, %101 : vector<8x128xf32>
    %103 = vector.shape_cast %102 : vector<8x128xf32> to vector<1x8x128xf32>
    %104 = vector.broadcast %103 : vector<1x8x128xf32> to vector<4x8x128xf32>
    %105 = arith.mulf %104, %4 : vector<4x8x128xf32>
    %cst_20 = arith.constant dense<0.000000e+00> : vector<4x128xf32>
    %106 = vector.multi_reduction <add>, %105, %cst_20 [1] : vector<4x8x128xf32> to vector<4x128xf32>
    %107 = vector.extract_strided_slice %0 {offsets = [0, 3, 0], sizes = [1, 1, 128], strides = [1, 1, 1]} : vector<3x5x128xf32> to vector<1x1x128xf32>
    %108 = vector.shape_cast %107 : vector<1x1x128xf32> to vector<1x128xf32>
    %109 = vector.extract_strided_slice %2 {offsets = [0, 0, 0], sizes = [1, 8, 128], strides = [1, 1, 1]} : vector<3x8x128xf32> to vector<1x8x128xf32>
    %110 = vector.shape_cast %109 : vector<1x8x128xf32> to vector<8x128xf32>
    %111 = vector.broadcast %108 : vector<1x128xf32> to vector<8x128xf32>
    %112 = arith.subf %111, %110 : vector<8x128xf32>
    %113 = arith.mulf %112, %112 : vector<8x128xf32>
    %114 = vector.extract_strided_slice %0 {offsets = [1, 3, 0], sizes = [1, 1, 128], strides = [1, 1, 1]} : vector<3x5x128xf32> to vector<1x1x128xf32>
    %115 = vector.shape_cast %114 : vector<1x1x128xf32> to vector<1x128xf32>
    %116 = vector.extract_strided_slice %2 {offsets = [1, 0, 0], sizes = [1, 8, 128], strides = [1, 1, 1]} : vector<3x8x128xf32> to vector<1x8x128xf32>
    %117 = vector.shape_cast %116 : vector<1x8x128xf32> to vector<8x128xf32>
    %118 = vector.broadcast %115 : vector<1x128xf32> to vector<8x128xf32>
    %119 = arith.subf %118, %117 : vector<8x128xf32>
    %120 = arith.mulf %119, %119 : vector<8x128xf32>
    %121 = arith.addf %113, %120 : vector<8x128xf32>
    %122 = vector.extract_strided_slice %0 {offsets = [2, 3, 0], sizes = [1, 1, 128], strides = [1, 1, 1]} : vector<3x5x128xf32> to vector<1x1x128xf32>
    %123 = vector.shape_cast %122 : vector<1x1x128xf32> to vector<1x128xf32>
    %124 = vector.extract_strided_slice %2 {offsets = [2, 0, 0], sizes = [1, 8, 128], strides = [1, 1, 1]} : vector<3x8x128xf32> to vector<1x8x128xf32>
    %125 = vector.shape_cast %124 : vector<1x8x128xf32> to vector<8x128xf32>
    %126 = vector.broadcast %123 : vector<1x128xf32> to vector<8x128xf32>
    %127 = arith.subf %126, %125 : vector<8x128xf32>
    %128 = arith.mulf %127, %127 : vector<8x128xf32>
    %129 = arith.addf %121, %128 : vector<8x128xf32>
    %130 = math.sqrt %129 : vector<8x128xf32>
    %cst_21 = arith.constant 1.66666663 : f32
    %131 = vector.broadcast %cst_21 : f32 to vector<8x128xf32>
    %132 = arith.mulf %130, %131 : vector<8x128xf32>
    %cst_22 = arith.constant 1.000000e+00 : f32
    %133 = vector.broadcast %cst_22 : f32 to vector<8x128xf32>
    %134 = arith.subf %133, %132 : vector<8x128xf32>
    %cst_23 = arith.constant 0.000000e+00 : f32
    %135 = vector.broadcast %cst_23 : f32 to vector<8x128xf32>
    %136 = arith.maximumf %134, %135 : vector<8x128xf32>
    %137 = vector.shape_cast %136 : vector<8x128xf32> to vector<1x8x128xf32>
    %138 = vector.broadcast %137 : vector<1x8x128xf32> to vector<4x8x128xf32>
    %139 = arith.mulf %138, %4 : vector<4x8x128xf32>
    %cst_24 = arith.constant dense<0.000000e+00> : vector<4x128xf32>
    %140 = vector.multi_reduction <add>, %139, %cst_24 [1] : vector<4x8x128xf32> to vector<4x128xf32>
    %141 = vector.extract_strided_slice %0 {offsets = [0, 4, 0], sizes = [1, 1, 128], strides = [1, 1, 1]} : vector<3x5x128xf32> to vector<1x1x128xf32>
    %142 = vector.shape_cast %141 : vector<1x1x128xf32> to vector<1x128xf32>
    %143 = vector.extract_strided_slice %2 {offsets = [0, 0, 0], sizes = [1, 8, 128], strides = [1, 1, 1]} : vector<3x8x128xf32> to vector<1x8x128xf32>
    %144 = vector.shape_cast %143 : vector<1x8x128xf32> to vector<8x128xf32>
    %145 = vector.broadcast %142 : vector<1x128xf32> to vector<8x128xf32>
    %146 = arith.subf %145, %144 : vector<8x128xf32>
    %147 = arith.mulf %146, %146 : vector<8x128xf32>
    %148 = vector.extract_strided_slice %0 {offsets = [1, 4, 0], sizes = [1, 1, 128], strides = [1, 1, 1]} : vector<3x5x128xf32> to vector<1x1x128xf32>
    %149 = vector.shape_cast %148 : vector<1x1x128xf32> to vector<1x128xf32>
    %150 = vector.extract_strided_slice %2 {offsets = [1, 0, 0], sizes = [1, 8, 128], strides = [1, 1, 1]} : vector<3x8x128xf32> to vector<1x8x128xf32>
    %151 = vector.shape_cast %150 : vector<1x8x128xf32> to vector<8x128xf32>
    %152 = vector.broadcast %149 : vector<1x128xf32> to vector<8x128xf32>
    %153 = arith.subf %152, %151 : vector<8x128xf32>
    %154 = arith.mulf %153, %153 : vector<8x128xf32>
    %155 = arith.addf %147, %154 : vector<8x128xf32>
    %156 = vector.extract_strided_slice %0 {offsets = [2, 4, 0], sizes = [1, 1, 128], strides = [1, 1, 1]} : vector<3x5x128xf32> to vector<1x1x128xf32>
    %157 = vector.shape_cast %156 : vector<1x1x128xf32> to vector<1x128xf32>
    %158 = vector.extract_strided_slice %2 {offsets = [2, 0, 0], sizes = [1, 8, 128], strides = [1, 1, 1]} : vector<3x8x128xf32> to vector<1x8x128xf32>
    %159 = vector.shape_cast %158 : vector<1x8x128xf32> to vector<8x128xf32>
    %160 = vector.broadcast %157 : vector<1x128xf32> to vector<8x128xf32>
    %161 = arith.subf %160, %159 : vector<8x128xf32>
    %162 = arith.mulf %161, %161 : vector<8x128xf32>
    %163 = arith.addf %155, %162 : vector<8x128xf32>
    %164 = math.sqrt %163 : vector<8x128xf32>
    %cst_25 = arith.constant 1.66666663 : f32
    %165 = vector.broadcast %cst_25 : f32 to vector<8x128xf32>
    %166 = arith.mulf %164, %165 : vector<8x128xf32>
    %cst_26 = arith.constant 1.000000e+00 : f32
    %167 = vector.broadcast %cst_26 : f32 to vector<8x128xf32>
    %168 = arith.subf %167, %166 : vector<8x128xf32>
    %cst_27 = arith.constant 0.000000e+00 : f32
    %169 = vector.broadcast %cst_27 : f32 to vector<8x128xf32>
    %170 = arith.maximumf %168, %169 : vector<8x128xf32>
    %171 = vector.shape_cast %170 : vector<8x128xf32> to vector<1x8x128xf32>
    %172 = vector.broadcast %171 : vector<1x8x128xf32> to vector<4x8x128xf32>
    %173 = arith.mulf %172, %4 : vector<4x8x128xf32>
    %cst_28 = arith.constant dense<0.000000e+00> : vector<4x128xf32>
    %174 = vector.multi_reduction <add>, %173, %cst_28 [1] : vector<4x8x128xf32> to vector<4x128xf32>
    %175 = tpu.concatenate %38, %72, %106, %140, %174 in 0 : vector<4x128xf32>, vector<4x128xf32>, vector<4x128xf32>, vector<4x128xf32>, vector<4x128xf32> -> vector<20x128xf32>
    %c0_29 = arith.constant 0 : index
    %c0_30 = arith.constant 0 : index
    %176 = vector.load %arg3[%c0_29, %c0_30] : memref<8x20xf32, #tpu.memory_space<vmem>>, vector<8x20xf32>
    %cst_31 = arith.constant dense<0.000000e+00> : vector<8x128xf32>
    %177 = tpu.matmul %176, %175, %cst_31 {dimension_numbers = #tpu.dot_dimension_numbers<[1], [0], [0], [1], [0, 0, 1, 1], [], []>} : vector<8x20xf32>, vector<20x128xf32>, vector<8x128xf32> -> vector<8x128xf32>
    %c0_32 = arith.constant 0 : index
    %c0_33 = arith.constant 0 : index
    %c0_34 = arith.constant 0 : index
    %178 = vector.load %arg6[%c0_32, %c0_33, %c0_34] : memref<1x8x128xf32, #tpu.memory_space<vmem>>, vector<1x8x128xf32>
    %179 = vector.shape_cast %178 : vector<1x8x128xf32> to vector<8x128xf32>
    %180 = vector.shape_cast %177 : vector<8x128xf32> to vector<1x8x128xf32>
    tpu.vector_store %arg6[%c0_32, %c0_33, %c0_34], %180 {strides = array<i32>} : memref<1x8x128xf32, #tpu.memory_space<vmem>>, vector<1x8x128xf32>,
    return
  }
  func.func @transform_0(%arg0: i32, %arg1: i32) -> (i32, i32, i32) {
    %c0_i32 = arith.constant 0 : i32
    %c0_i32_0 = arith.constant 0 : i32
    %c0_i32_1 = arith.constant 0 : i32
    return %c0_i32, %c0_i32_0, %arg1 : i32, i32, i32
  }
  func.func @transform_1(%arg0: i32, %arg1: i32) -> (i32, i32) {
    %c0_i32 = arith.constant 0 : i32
    %c0_i32_0 = arith.constant 0 : i32
    %c0_i32_1 = arith.constant 0 : i32
    return %c0_i32, %c0_i32_0 : i32, i32
  }
  func.func @transform_2(%arg0: i32, %arg1: i32) -> (i32, i32, i32, i32) {
    %c0_i32 = arith.constant 0 : i32
    %c0_i32_0 = arith.constant 0 : i32
    %c0_i32_1 = arith.constant 0 : i32
    return %arg0, %c0_i32, %c0_i32_0, %arg1 : i32, i32, i32, i32
  }
  func.func @transform_3(%arg0: i32, %arg1: i32) -> (i32, i32, i32, i32) {
    %c0_i32 = arith.constant 0 : i32
    %c0_i32_0 = arith.constant 0 : i32
    %c0_i32_1 = arith.constant 0 : i32
    return %arg0, %c0_i32, %c0_i32_0, %arg1 : i32, i32, i32, i32
  }
  func.func @transform_4(%arg0: i32, %arg1: i32) -> (i32, i32, i32) {
    %c0_i32 = arith.constant 0 : i32
    %c0_i32_0 = arith.constant 0 : i32
    return %arg0, %c0_i32, %arg1 : i32, i32, i32
  }
}

</mosaic_0001>

<bundles_post_ra>
// kernel: tpu_custom_call.1
= control target key start
LH: loop header
LB: loop body
LE: loop exit
PB: predicated region body
PF: predicated region fallthrough
CT: control target
= control target key end

     0   :  { %9 = vsyncpa [#allocation3], 0  ;;  %s1493_s0 = inlined_call_operand.vmem [shape: f32[3,5,128], index: 0, kind: input, shape index: {}]   ;;  %s1494_s1 = inlined_call_operand.hbm [shape: f32[8,20], index: 1, kind: input, shape index: {}]   ;;  %s1495_s2 = inlined_call_operand.vmem [shape: f32[2,3,8,128], index: 2, kind: input, shape index: {}]   ;;  %s1496_s3 = inlined_call_operand.hbm [shape: f32[2,4,8,128], index: 3, kind: input, shape index: {}]   ;;  %s1497_s4 = inlined_call_operand.hbm [shape: f32[2,8,128], index: 4, kind: output, shape index: {}]  }
   0x1   :  { %10 = vsyncpa [#allocation6], 0 }
   0x2   :  { %12 = vsyncpa [#allocation6 + $0x1], 0 }
   0x3   :  { %13 = vsyncpa [#allocation4], 0 }
   0x4   :  { %15 = vsyncpa [#allocation4 + $0x1], 0  ;;  %s1166_s15 = smov 0   ;;  %s1168_s16 = smov 0  }
   0x5   :  { %s1170_s17 = smov 0   ;;  %s1172_s18 = smov 0  }
   0x6   :  { %s1174_s19 = smov 0   ;;  %s1176_s20 = smov 0  }
   0x7 LB: > { %s861_s21 = sadd.s32 4294967295, %s1131_s20   ;;  %s862_s22 = sadd.s32 4294967294, %s1131_s20   ;;  %s1131_s20 = sphi %s1176_s20, %s21_s20   ;;  %s1127_s19 = sphi %s1174_s19, %s1525_s19   ;;  %s1123_s18 = sphi %s1172_s18, %s1524_s18   ;;  %s1119_s17 = sphi %s1170_s17, %s1523_s17   ;;  %s1115_s16 = sphi %s1168_s16, %s1522_s16   ;;  %s1111_s15 = sphi %s1166_s15, %s1521_s15  }
   0x8   : > { %s117_s23 = sadd.s32 1, %s1119_s17  ;;  %p124_p0 = scmp.ne.s32.totalorder %s1119_s17, %s1115_s16 }
   0x9   : > { %p125_p1 = scmp.eq.s32.totalorder %s1131_s20, 0  ;;  %p130_p2 = scmp.ne.s32.totalorder %s1115_s16, %s1111_s15 }
   0xa   : > { %p1204_p3 = scmp.eq.s32.totalorder %s861_s21, 0  ;;  %p156_p4 = scmp.eq.s32.totalorder %s861_s21, 1 }
   0xb   : > { %p1208_p5 = por %p125_p1, %p124_p0  ;;  %p162_p6 = scmp.eq.s32.totalorder %s862_s22, 1 }
   0xc   : > { %s1504_s24 = scalar_select %p1204_p3, 1, 0 }
   0xd   : > { %p1214_p7 = por %p1204_p3, %p130_p2  ;;  %p1218_p8 = por %p156_p4, %p124_p0 }
   0xe   : > { %p1222_p9 = por %p162_p6, %p130_p2  ;;  %p863_p10 = scmp.ge.s32.totalorder %s1131_s20, 1 }
   0xf   : > { %s1506_s26 = scalar_select %p1214_p7, 1, 0 }
  0x10   : > { %s1507_s27 = scalar_select %p1218_p8, 1, 0 }
  0x11   : > { %s1508_s28 = scalar_select %p1222_p9, 1, 0 }
  0x12   : > { %p169_p11 = scmp.lt.s32.totalorder %s1131_s20, 3  ;;  %s1133_s30 = smov [#allocation2]  }
  0x13   : > { %s189_s5 = sshll.u32 %s1133_s30, 4  ;;  %p920_p1 = scmp.lt.s32.totalorder %s1131_s20, 2  ;;  %s190_s5 = int_to_ptr.vmem [resolvable:$true] %s189_s5 }
  0x14   : > { %p1229_p13 = pnand %p863_p10, %p169_p11  ;;  %s33_s8 = sadd.s32 1, %s1127_s19 }
  0x15   : > { %p1238_p4 = pnand %p920_p1, %p1208_p5  ;;  %p1249_p6 = scmp.ge.s32.totalorder %s33_s8, 2 }
  0x16   : > { %s1509_s29 = scalar_select %p1229_p13, 1, 0 }
  0x17   : > { %p907_p0 = pneg %p1229_p13  ;;  %s211_s10 = sand.u32 1, %s1119_s17  }
  0x18   : > { %s1510_s6 = scalar_select %p1238_p4, 1, 0 }
  0x19   : > { %p1244_p2 = pnand %p907_p0, %p1204_p3  ;;  %s987_s13 = scalar_lea.hbm %s1494_s1, 128 }
  0x1a   : > { %s1512_s9 = scalar_select %p1249_p6, 1, 0 }
  0x1b   : > { %p988_p5 = scmp.ne.s32.totalorder %s1494_s1, %s987_s13  ;;  %p989_p10 = pneg %p1244_p2 }
  0x1c   : > { %p994_p0 = scmp.lt.u32.totalorder %s987_s13, %s1494_s1 }
  0x1d   : > { %p990_p11 = pnand %p989_p10, %p988_p5 }
  0x1f   : > { %p991_p1 = pneg %p990_p11 }
  0x21   : > { %p996_p12 = pnand %p994_p0, %p991_p1 }
  0x23   : > { %999 = shalt.err (!%p996_p12)
}
  0x24   : > { %s1000_s30 = scalar_lea.vmem %s190_s5, 128  ;;  %p1008_p3 = scmp.lt.s32.totalorder %s190_s5, %s190_s5 }
  0x25   : > { %p1001_p9 = scmp.ne.s32.totalorder %s190_s5, %s1000_s30  ;;  %p1009_p13 = scmp.lt.s32.totalorder %s1000_s30, %s1000_s30 }
  0x27   : > { %p1003_p8 = pnand %p1001_p9, %p989_p10  ;;  %p1010_p4 = por %p1009_p13, %p1008_p3 }
  0x29   : > { %p1004_p7 = pneg %p1003_p8 }
  0x2b   : > { %p1011_p6 = pnand %p1010_p4, %p1004_p7 }
  0x2d   : > { %1014 = shalt.err (!%p1011_p6)
}
  0x2e   : > { %910 = dma.hbm_to_vmem [thread:$0]  (!%p1244_p2), %s1494_s1, 128, %s190_s5, [#allocation3]  }
  0x2f   : > { %p1513_p9 = scmp.ne.s32.totalorder %s1512_s9, 0  ;;  %s867_s13 = sshll.u32 %s211_s10, 5 }
  0x30   : > { %s881_s21 = sshll.u32 %s1127_s19, 9  ;;  %s215_s30 = scalar_lea.vmem [#allocation5], %s867_s13 }
  0x31   : > { %s1527_s8 = smov (%p1513_p9, %s33_s8), 0  ;;  %s1280_s25 = scalar_lea.hbm %s1496_s3, %s881_s21 }
  0x32   : > { %s112_s14 = ssub.s32 %s1127_s19, %s1527_s8  ;;  %s223_s11 = sshll.u32 %s215_s30, 4  ;;  %s1287_s11 = int_to_ptr.vmem [resolvable:$true] %s223_s11 }
  0x33   : > { %p115_p3 = scmp.eq.s32.totalorder %s112_s14, 0  ;;  %s1289_s9 = scalar_lea.sflag [#allocation6], %s211_s10 }
  0x34   : > { %s1015_s12 = scalar_lea.hbm %s1280_s25, 512  ;;  %p1514_p8 = scmp.ne.s32.totalorder %s1510_s6, 0 }
  0x35   : > { %s1285_s5 = scalar_select %p115_p3, %s1119_s17, %s117_s23  }
  0x36   : > { %p1016_p7 = scmp.ne.s32.totalorder %s1280_s25, %s1015_s12  ;;  %p1017_p12 = pneg %p1514_p8 }
  0x37   : > { %s1020_s13 = scalar_lea.hbm %s1496_s3, 1024  ;;  %p1021_p2 = scmp.lt.u32.totalorder %s1280_s25, %s1496_s3 }
  0x38   : > { %p1018_p13 = pnand %p1017_p12, %p1016_p7  ;;  %p1022_p6 = scmp.lt.u32.totalorder %s1020_s13, %s1015_s12 }
  0x39   : > { %p1024_p10 = scmp.lt.u32.totalorder %s1015_s12, %s1280_s25 }
  0x3a   : > { %p1019_p4 = pneg %p1018_p13  ;;  %p1023_p5 = por %p1022_p6, %p1021_p2 }
  0x3c   : > { %p1025_p11 = por %p1024_p10, %p1023_p5 }
  0x3e   : > { %p1026_p1 = pnand %p1025_p11, %p1019_p4 }
  0x40   : > { %1029 = shalt.err (!%p1026_p1)
}
  0x41   : > { %s1030_s23 = scalar_lea.vmem %s1287_s11, 512  ;;  %s1134_s10 = smov [#allocation5]  }
  0x42   : > { %p1031_p0 = scmp.ne.s32.totalorder %s1287_s11, %s1030_s23  ;;  %s1035_s30 = sshll.u32 %s1134_s10, 4  ;;  %s1036_s30 = int_to_ptr.vmem [resolvable:$false] %s1035_s30 }
  0x43   : > { %s1037_s14 = scalar_lea.vmem %s1036_s30, 1024  ;;  %p1038_p7 = scmp.lt.s32.totalorder %s1287_s11, %s1036_s30 }
  0x44   : > { %p1033_p9 = pnand %p1031_p0, %p1017_p12  ;;  %p1039_p13 = scmp.lt.s32.totalorder %s1037_s14, %s1030_s23 }
  0x46   : > { %p1034_p3 = pneg %p1033_p9  ;;  %p1040_p2 = por %p1039_p13, %p1038_p7 }
  0x48   : > { %p1041_p6 = pnand %p1040_p2, %p1034_p3 }
  0x4a   : > { %1044 = shalt.err (!%p1041_p6)
}
  0x4b   : > { %s1135_s12 = smov 128   ;;  %s1136_s21 = smov 8  }
  0x4c   : > { %914 = dma.hbm_to_vmem [thread:$0]  (!%p1514_p8), %s1280_s25, 512, %s1287_s11, %s1289_s9, %s1135_s12, %s1135_s12, %s1136_s21  }
  0x4d   : > { %p1515_p12 = scmp.ne.s32.totalorder %s1509_s29, 0 }
  0x4e   : > { %p1516_p4 = scmp.ne.s32.totalorder (!%p1515_p12), %s1504_s24, 0 }
  0x4f   : > { %235 = sbr.rel (%p1515_p12) target bundleno = 405 (0x195), region = 36 }
  0x56   : > { %1098 = dma.done.wait (%p1516_p4), [#allocation3], 128  }
  0x57   : > { %1100 = vsyncadd (%p1516_p4), [#allocation3], 4294967168  ;;  %s1324_s13 = sand.u32 1, %s1115_s16   ;;  %p1517_p8 = scmp.ne.s32.totalorder %s1506_s26, 0 }
  0x58   : > { %s872_s7 = sshll.u32 %s1324_s13, 5  ;;  %s242_s22 = scalar_lea.sflag [#allocation6], %s1324_s13 }
  0x59   : > { %s1328_s23 = scalar_lea.vmem [#allocation5], %s872_s7 }
  0x5a   : > { %1102 = dma.done.wait (%p1517_p8), %s242_s22, 512  }
  0x5b   : > { %1104 = vsyncadd (%p1517_p8), %s242_s22, 4294966784  ;;  %p286_p5 = scmp.lt.s32.totalorder %s1123_s18, 1  ;;  %v304_v0 = vlaneseq  ;;  %v1137_v1 = vmov 0.0|0.0   ;;  %vm1138_vm0 = vmmov 0   ;;  %v1139_v3 = vmov 0.0   ;;  %s873_s21 = sshll.u32 %s1324_s13, 3 }
  0x5c   : > { %895 = vmatprep.subr.bf16.mxu0 %v1137_v1  ;;  %892 = vmatprep.mubr.msk.f32.mxu0 %vm1138_vm0, %v1139_v3  ;;  %v294_v8 = vld [vmem:[%s1493_s0] sm:$0x1f]  ;;  %v295_v9 = vld [vmem:[%s1493_s0 + $0x8] sm:$0x1f]  ;;  %v296_v10 = vld [vmem:[%s1493_s0 + $0x10] sm:$0x1f] }
  0x5d   : > { %s287_s24 = scalar_select %p286_p5, %s1123_s18, 1  ;;  %v305_v2 = vshrl.u32 %v304_v0, 7  ;;  %vm598_vm7 = vcmask 1041409   ;;  %vm609_vm8 = vcmask 1045509   ;;  %vm600_vm13 = vcmask 1042434  }
  0x5e   : > { %vm611_vm14 = vcmask 1046534   ;;  %vm602_vm15 = vcmask 1043459   ;;  %vm613_vm0 = vcmask 1047559   ;;  %s281_s7 = scalar_lea.vmem [#allocation7], %s873_s21  ;;  %s721_s25 = scalar_lea.sflag [#allocation4], %s1324_s13 }
  0x5f   : > { %s898_s29 = smul.u32 24, %s287_s24  ;;  %v306_v4 = vsub.s32 0, %v305_v2  ;;  %v364_v5 = vsub.s32 1, %v305_v2  ;;  %v422_v6 = vsub.s32 2, %v305_v2  ;;  %v480_v7 = vsub.s32 3, %v305_v2  ;;  %s735_s22 = sshll.u32 %s281_s7, 4  ;;  %s1441_s22 = int_to_ptr.vmem [resolvable:$true] %s735_s22 }
  0x60   : > { %v538_v36 = vsub.s32 4, %v305_v2  ;;  %p1518_p11 = scmp.ne.s32.totalorder %s1507_s27, 0 }
  0x61   : > { %s293_s26 = scalar_lea.vmem %s1495_s2, %s898_s29  ;;  %v307_v14 = vrot.slane %v294_v8, %v306_v4  ;;  %v313_v15 = vrot.slane %v295_v9, %v306_v4  ;;  %v320_v16 = vrot.slane %v296_v10, %v306_v4  ;;  %v365_v17 = vrot.slane %v294_v8, %v364_v5 }
  0x62   : > { %v297_v11 = vld [vmem:[%s293_s26] sm:$0xff]  ;;  %v298_v12 = vld [vmem:[%s293_s26 + $0x8] sm:$0xff]  ;;  %v299_v13 = vld [vmem:[%s293_s26 + $0x10] sm:$0xff]  ;;  %v371_v18 = vrot.slane %v295_v9, %v364_v5  ;;  %v378_v19 = vrot.slane %v296_v10, %v364_v5  ;;  %v423_v20 = vrot.slane %v294_v8, %v422_v6  ;;  %v429_v21 = vrot.slane %v295_v9, %v422_v6  ;;  %s1045_s26 = scalar_lea.vmem %s1441_s22, 128 }
  0x63   : > { %v308_v22 = vsub.f32 %v307_v14, %v297_v11  ;;  %v314_v23 = vsub.f32 %v313_v15, %v298_v12  ;;  %v321_v24 = vsub.f32 %v320_v16, %v299_v13  ;;  %v366_v25 = vsub.f32 %v365_v17, %v297_v11  ;;  %p1046_p10 = scmp.ne.s32.totalorder %s1441_s22, %s1045_s26 }
  0x64   : > { %v372_v26 = vsub.f32 %v371_v18, %v298_v12  ;;  %v379_v27 = vsub.f32 %v378_v19, %v299_v13  ;;  %v424_v28 = vsub.f32 %v423_v20, %v297_v11  ;;  %v430_v29 = vsub.f32 %v429_v21, %v298_v12  ;;  %v1357_v20 = vld [vmem:[%s1328_s23] sm:$0xff] }
  0x65   : > { %v309_v30 = vmul.f32 %v308_v22, %v308_v22  ;;  %v315_v31 = vmul.f32 %v314_v23, %v314_v23  ;;  %v322_v32 = vmul.f32 %v321_v24, %v321_v24  ;;  %v367_v33 = vmul.f32 %v366_v25, %v366_v25  ;;  %v1362_v23 = vld [vmem:[%s1328_s23 + $0x8] sm:$0xff]  ;;  %v1365_v24 = vld [vmem:[%s1328_s23 + $0x10] sm:$0xff]  ;;  %v1368_v25 = vld [vmem:[%s1328_s23 + $0x18] sm:$0xff]  ;;  %s878_s23 = sshll.u32 %s1123_s18, 7  ;;  %p1047_p1 = pnand %p1046_p10, %p1518_p11 }
  0x66   : > { %v373_v34 = vmul.f32 %v372_v26, %v372_v26  ;;  %v380_v35 = vmul.f32 %v379_v27, %v379_v27  ;;  %v425_v38 = vmul.f32 %v424_v28, %v424_v28  ;;  %v431_v39 = vmul.f32 %v430_v29, %v430_v29  ;;  %s1446_s6 = scalar_lea.hbm %s1497_s4, %s878_s23  ;;  %s1140_s18 = smov [#allocation7]  }
  0x67   : > { %v316_v37 = vadd.f32 %v315_v31, %v309_v30  ;;  %v436_v40 = vrot.slane %v296_v10, %v422_v6  ;;  %v481_v44 = vrot.slane %v294_v8, %v480_v7  ;;  %v487_v45 = vrot.slane %v295_v9, %v480_v7  ;;  %p1048_p0 = pneg %p1047_p1  ;;  %s1049_s11 = sshll.u32 %s1140_s18, 4  ;;  %s1050_s11 = int_to_ptr.vmem [resolvable:$false] %s1049_s11 }
  0x68   : > { %v374_v41 = vadd.f32 %v373_v34, %v367_v33  ;;  %v432_v47 = vadd.f32 %v431_v39, %v425_v38  ;;  %v539_v48 = vrot.slane %v294_v8, %v538_v36  ;;  %v545_v49 = vrot.slane %v295_v9, %v538_v36  ;;  %s1051_s9 = scalar_lea.vmem %s1050_s11, 256  ;;  %p1052_p9 = scmp.lt.s32.totalorder %s1441_s22, %s1050_s11 }
  0x69   : > { %v323_v42 = vadd.f32 %v322_v32, %v316_v37  ;;  %v437_v43 = vsub.f32 %v436_v40, %v299_v13  ;;  %v482_v51 = vsub.f32 %v481_v44, %v297_v11  ;;  %v488_v52 = vsub.f32 %v487_v45, %v298_v12  ;;  %p1053_p3 = scmp.lt.s32.totalorder %s1051_s9, %s1045_s26 }
  0x6a   : > { %v381_v46 = vadd.f32 %v380_v35, %v374_v41  ;;  %v494_v53 = vrot.slane %v296_v10, %v480_v7  ;;  %v540_v55 = vsub.f32 %v539_v48, %v297_v11  ;;  %v546_v56 = vsub.f32 %v545_v49, %v298_v12 }
  0x6b   : > { %977 = vrsqrt.f32 %v323_v42  ;;  %v438_v50 = vmul.f32 %v437_v43, %v437_v43  ;;  %v552_v57 = vrot.slane %v296_v10, %v538_v36  ;;  %v483_v58 = vmul.f32 %v482_v51, %v482_v51  ;;  %p1054_p7 = por %p1053_p3, %p1052_p9 }
  0x6c   : > { %979 = vrsqrt.f32 %v381_v46  ;;  %v489_v59 = vmul.f32 %v488_v52, %v488_v52  ;;  %v495_v60 = vsub.f32 %v494_v53, %v299_v13  ;;  %v541_v61 = vmul.f32 %v540_v55, %v540_v55 }
  0x6d   : > { %v1349_v54 = vadd.f32 %v438_v50, %v432_v47  ;;  %v547_v62 = vmul.f32 %v546_v56, %v546_v56  ;;  %v553_v63 = vsub.f32 %v552_v57, %v299_v13  ;;  %vm326_vm1 = vcmp.eq.f32.partialorder %v323_v42, inf  ;;  %p1055_p13 = pnand %p1054_p7, %p1048_p0 }
  0x6e   : > { %v329_v1 = vand.u32 2147483648, %v323_v42  ;;  %v490_v2 = vadd.f32 %v489_v59, %v483_v58  ;;  %v496_v4 = vmul.f32 %v495_v60, %v495_v60  ;;  %vm328_vm2 = vcmp.eq.f32.partialorder %v323_v42, 0.0 }
  0x6f   : > { %981 = vrsqrt.f32 %v1349_v54  ;;  %vm384_vm3 = vcmp.eq.f32.partialorder %v381_v46, inf  ;;  %v387_v7 = vand.u32 2147483648, %v381_v46  ;;  %vm386_vm4 = vcmp.eq.f32.partialorder %v381_v46, 0.0 }
  0x70   : > { %v548_v9 = vadd.f32 %v547_v62, %v541_v61  ;;  %v554_v10 = vmul.f32 %v553_v63, %v553_v63  ;;  %v1352_v14 = vadd.f32 %v496_v4, %v490_v2  ;;  %vm442_vm5 = vcmp.eq.f32.partialorder %v1349_v54, inf }
  0x71   : > { %vm444_vm6 = vcmp.eq.f32.partialorder %v1349_v54, 0.0  ;;  %v445_v30 = vand.u32 2147483648, %v1349_v54 }
  0x72   : > { %v1354_v19 = vadd.f32 %v554_v10, %v548_v9  ;;  %983 = vrsqrt.f32 %v1352_v14  ;;  %vm500_vm9 = vcmp.eq.f32.partialorder %v1352_v14, inf  ;;  %v503_v9 = vand.u32 2147483648, %v1352_v14 }
  0x73   : > { %vm502_vm10 = vcmp.eq.f32.partialorder %v1352_v14, 0.0 }
  0x74   : > { %985 = vrsqrt.f32 %v1354_v19  ;;  %vm558_vm11 = vcmp.eq.f32.partialorder %v1354_v19, inf  ;;  %vm560_vm12 = vcmp.eq.f32.partialorder %v1354_v19, 0.0 }
  0x75   : > { %v978_v0 = vpop.eup %977 }
  0x76   : > { %v980_v5 = vpop.eup %979  ;;  %v325_v6 = vmul.f32 %v978_v0, %v323_v42 }
  0x77   : > { %v383_v8 = vmul.f32 %v980_v5, %v381_v46 }
  0x78   : > { %v327_v11 = vsel %vm326_vm1, %v323_v42, %v325_v6  ;;  %vm639_vm1 = vcmask 1043456  }
  0x79   : > { %v330_v12 = vsel %vm328_vm2, %v329_v1, %v327_v11  ;;  %v385_v13 = vsel %vm384_vm3, %v381_v46, %v383_v8  ;;  %v982_v17 = vpop.eup %981  ;;  %vm643_vm2 = vcmask 162816  }
  0x7a   : > { %v331_v15 = vmul.f32 1.6666666, %v330_v12  ;;  %v388_v16 = vsel %vm386_vm4, %v387_v7, %v385_v13  ;;  %v441_v22 = vmul.f32 %v982_v17, %v1349_v54 }
  0x7b   : > { %v389_v18 = vmul.f32 1.6666666, %v388_v16 }
  0x7c   : > { %v332_v21 = vsub.f32 1.0, %v331_v15  ;;  %v443_v29 = vsel %vm442_vm5, %v1349_v54, %v441_v22  ;;  %v984_v60 = vpop.eup %983  ;;  %v561_v22 = vand.u32 2147483648, %v1354_v19 }
  0x7d   : > { %v390_v26 = vsub.f32 1.0, %v389_v18  ;;  %v446_v12 = vsel %vm444_vm6, %v445_v30, %v443_v29  ;;  %v499_v13 = vmul.f32 %v984_v60, %v1352_v14 }
  0x7e   : > { %v333_v27 = vmax.f32 %v332_v21, 0.0  ;;  %v986_v5 = vpop.eup %985  ;;  %v447_v54 = vmul.f32 1.6666666, %v446_v12 }
  0x7f   : > { %v391_v28 = vmax.f32 %v390_v26, 0.0  ;;  %v501_v29 = vsel %vm500_vm9, %v1352_v14, %v499_v13  ;;  %v557_v30 = vmul.f32 %v986_v5, %v1354_v19 }
  0x80   : > { %v334_v31 = vmul.f32 %v333_v27, %v1357_v20  ;;  %v335_v32 = vmul.f32 %v333_v27, %v1362_v23  ;;  %v336_v33 = vmul.f32 %v333_v27, %v1365_v24  ;;  %v337_v34 = vmul.f32 %v333_v27, %v1368_v25 }
  0x81   : > { %v392_v35 = vmul.f32 %v391_v28, %v1357_v20  ;;  %v393_v36 = vmul.f32 %v391_v28, %v1362_v23  ;;  %v394_v37 = vmul.f32 %v391_v28, %v1365_v24  ;;  %v395_v38 = vmul.f32 %v391_v28, %v1368_v25 }
  0x82   : > { %v338_v39 = vrot.slane %v334_v31, 4  ;;  %v344_v40 = vrot.slane %v335_v32, 4  ;;  %v350_v41 = vrot.slane %v336_v33, 4  ;;  %v356_v42 = vrot.slane %v337_v34, 4 }
  0x83   : > { %v396_v43 = vrot.slane %v392_v35, 4  ;;  %v402_v44 = vrot.slane %v393_v36, 4  ;;  %v408_v45 = vrot.slane %v394_v37, 4  ;;  %v414_v46 = vrot.slane %v395_v38, 4 }
  0x84   : > { %v339_v47 = vadd.f32 %v338_v39, %v334_v31  ;;  %v345_v48 = vadd.f32 %v344_v40, %v335_v32  ;;  %v351_v49 = vadd.f32 %v350_v41, %v336_v33  ;;  %v357_v50 = vadd.f32 %v356_v42, %v337_v34 }
  0x85   : > { %v397_v51 = vadd.f32 %v396_v43, %v392_v35  ;;  %v403_v52 = vadd.f32 %v402_v44, %v393_v36  ;;  %v409_v53 = vadd.f32 %v408_v45, %v394_v37  ;;  %v415_v55 = vadd.f32 %v414_v46, %v395_v38 }
  0x86   : > { %v340_v56 = vrot.slane %v339_v47, 2  ;;  %v346_v57 = vrot.slane %v345_v48, 2  ;;  %v352_v58 = vrot.slane %v351_v49, 2  ;;  %v358_v59 = vrot.slane %v357_v50, 2 }
  0x87   : > { %v398_v61 = vrot.slane %v397_v51, 2  ;;  %v404_v62 = vrot.slane %v403_v52, 2  ;;  %v410_v63 = vrot.slane %v409_v53, 2  ;;  %v416_v0 = vrot.slane %v415_v55, 2 }
  0x88   : > { %v341_v1 = vadd.f32 %v340_v56, %v339_v47  ;;  %v347_v2 = vadd.f32 %v346_v57, %v345_v48  ;;  %v353_v4 = vadd.f32 %v352_v58, %v351_v49  ;;  %v359_v15 = vadd.f32 %v358_v59, %v357_v50 }
  0x89   : > { %v399_v6 = vadd.f32 %v398_v61, %v397_v51  ;;  %v405_v7 = vadd.f32 %v404_v62, %v403_v52  ;;  %v411_v8 = vadd.f32 %v410_v63, %v409_v53  ;;  %v417_v18 = vadd.f32 %v416_v0, %v415_v55 }
  0x8a   : > { %v342_v10 = vrot.slane %v341_v1, 1  ;;  %v348_v11 = vrot.slane %v347_v2, 1  ;;  %v354_v21 = vrot.slane %v353_v4, 1  ;;  %v360_v33 = vrot.slane %v359_v15, 1 }
  0x8b   : > { %v400_v16 = vrot.slane %v399_v6, 1  ;;  %v406_v17 = vrot.slane %v405_v7, 1  ;;  %v412_v31 = vrot.slane %v411_v8, 1  ;;  %v418_v34 = vrot.slane %v417_v18, 1 }
  0x8c   : > { %v343_v26 = vadd.f32 %v342_v10, %v341_v1  ;;  %v349_v27 = vadd.f32 %v348_v11, %v347_v2  ;;  %v504_v35 = vsel %vm502_vm10, %v503_v9, %v501_v29  ;;  %v448_v36 = vsub.f32 1.0, %v447_v54 }
  0x8d   : > { %v401_v28 = vadd.f32 %v400_v16, %v399_v6  ;;  %v407_v32 = vadd.f32 %v406_v17, %v405_v7  ;;  %v505_v37 = vmul.f32 1.6666666, %v504_v35  ;;  %v355_v38 = vadd.f32 %v354_v21, %v353_v4 }
  0x8e   : > { %v413_v39 = vadd.f32 %v412_v31, %v411_v8  ;;  %v599_v40 = vsel %vm598_vm7, %v349_v27, %v343_v26  ;;  %v559_v41 = vsel %vm558_vm11, %v1354_v19, %v557_v30  ;;  %v449_v14 = vmax.f32 %v448_v36, 0.0 }
  0x8f   : > { %v506_v42 = vsub.f32 1.0, %v505_v37  ;;  %v610_v43 = vsel %vm609_vm8, %v407_v32, %v401_v28  ;;  %v562_v44 = vsel %vm560_vm12, %v561_v22, %v559_v41  ;;  %v1401_v45 = vadd.f32 %v360_v33, %v359_v15 }
  0x90   : > { %v1403_v46 = vadd.f32 %v418_v34, %v417_v18  ;;  %v1405_v47 = vmul.f32 1.6666666, %v562_v44  ;;  %v450_v48 = vmul.f32 %v449_v14, %v1357_v20  ;;  %v451_v49 = vmul.f32 %v449_v14, %v1362_v23 }
  0x91   : > { %v452_v50 = vmul.f32 %v449_v14, %v1365_v24  ;;  %v453_v51 = vmul.f32 %v449_v14, %v1368_v25  ;;  %v507_v19 = vmax.f32 %v506_v42, 0.0  ;;  %v601_v52 = vsel %vm600_vm13, %v355_v38, %v599_v40 }
  0x92   : > { %v612_v53 = vsel %vm611_vm14, %v413_v39, %v610_v43  ;;  %v564_v55 = vsub.f32 1.0, %v1405_v47  ;;  %v454_v56 = vrot.slane %v450_v48, 4  ;;  %v460_v57 = vrot.slane %v451_v49, 4 }
  0x93   : > { %v466_v58 = vrot.slane %v452_v50, 4  ;;  %v472_v59 = vrot.slane %v453_v51, 4  ;;  %v508_v60 = vmul.f32 %v507_v19, %v1357_v20  ;;  %v509_v61 = vmul.f32 %v507_v19, %v1362_v23 }
  0x94   : > { %v510_v62 = vmul.f32 %v507_v19, %v1365_v24  ;;  %v511_v63 = vmul.f32 %v507_v19, %v1368_v25  ;;  %v455_v0 = vadd.f32 %v454_v56, %v450_v48  ;;  %v461_v1 = vadd.f32 %v460_v57, %v451_v49 }
  0x95   : > { %v467_v2 = vadd.f32 %v466_v58, %v452_v50  ;;  %v473_v4 = vadd.f32 %v472_v59, %v453_v51  ;;  %v512_v5 = vrot.slane %v508_v60, 4  ;;  %v518_v6 = vrot.slane %v509_v61, 4 }
  0x96   : > { %v524_v7 = vrot.slane %v510_v62, 4  ;;  %v530_v8 = vrot.slane %v511_v63, 4  ;;  %v456_v9 = vrot.slane %v455_v0, 2  ;;  %v462_v10 = vrot.slane %v461_v1, 2 }
  0x97   : > { %v468_v11 = vrot.slane %v467_v2, 2  ;;  %v474_v12 = vrot.slane %v473_v4, 2  ;;  %v513_v13 = vadd.f32 %v512_v5, %v508_v60  ;;  %v519_v15 = vadd.f32 %v518_v6, %v509_v61 }
  0x98   : > { %v525_v16 = vadd.f32 %v524_v7, %v510_v62  ;;  %v531_v17 = vadd.f32 %v530_v8, %v511_v63  ;;  %v457_v18 = vadd.f32 %v456_v9, %v455_v0  ;;  %v463_v21 = vadd.f32 %v462_v10, %v461_v1 }
  0x99   : > { %v469_v22 = vadd.f32 %v468_v11, %v467_v2  ;;  %v475_v26 = vadd.f32 %v474_v12, %v473_v4  ;;  %v514_v27 = vrot.slane %v513_v13, 2  ;;  %v520_v28 = vrot.slane %v519_v15, 2 }
  0x9a   : > { %v526_v31 = vrot.slane %v525_v16, 2  ;;  %v532_v32 = vrot.slane %v531_v17, 2  ;;  %v458_v54 = vrot.slane %v457_v18, 1  ;;  %v464_v29 = vrot.slane %v463_v21, 1 }
  0x9b   : > { %v470_v30 = vrot.slane %v469_v22, 1  ;;  %v476_v33 = vrot.slane %v475_v26, 1  ;;  %v515_v34 = vadd.f32 %v514_v27, %v513_v13  ;;  %v521_v35 = vadd.f32 %v520_v28, %v519_v15 }
  0x9c   : > { %v527_v36 = vadd.f32 %v526_v31, %v525_v16  ;;  %v533_v37 = vadd.f32 %v532_v32, %v531_v17  ;;  %v459_v38 = vadd.f32 %v458_v54, %v457_v18  ;;  %v465_v39 = vadd.f32 %v464_v29, %v463_v21 }
  0x9d   : > { %v471_v40 = vadd.f32 %v470_v30, %v469_v22  ;;  %v477_v41 = vadd.f32 %v476_v33, %v475_v26  ;;  %v516_v14 = vrot.slane %v515_v34, 1  ;;  %v522_v42 = vrot.slane %v521_v35, 1 }
  0x9e   : > { %v528_v43 = vrot.slane %v527_v36, 1  ;;  %v534_v44 = vrot.slane %v533_v37, 1  ;;  %v603_v47 = vsel %vm602_vm15, %v1401_v45, %v601_v52  ;;  %v614_v48 = vsel %vm613_vm0, %v1403_v46, %v612_v53 }
  0x9f   : > { %v620_v49 = vsel %vm598_vm7, %v465_v39, %v459_v38  ;;  %v565_v50 = vmax.f32 %v564_v55, 0.0  ;;  %v517_v51 = vadd.f32 %v516_v14, %v515_v34  ;;  %v523_v19 = vadd.f32 %v522_v42, %v521_v35 }
  0xa0   : > { %v529_v56 = vadd.f32 %v528_v43, %v527_v36  ;;  %v535_v57 = vadd.f32 %v534_v44, %v533_v37  ;;  %v621_v58 = vsel %vm600_vm13, %v471_v40, %v620_v49  ;;  %v640_v46 = vsel %vm639_vm1, %v603_v47, %v614_v48 }
  0xa1   : > { %v566_v59 = vmul.f32 %v565_v50, %v1357_v20  ;;  %v567_v60 = vmul.f32 %v565_v50, %v1362_v23  ;;  %v568_v61 = vmul.f32 %v565_v50, %v1365_v24  ;;  %v622_v45 = vsel %vm602_vm15, %v477_v41, %v621_v58 }
  0xa2   : > { %v628_v52 = vsel %vm609_vm8, %v523_v19, %v517_v51  ;;  %v569_v53 = vmul.f32 %v565_v50, %v1368_v25 }
  0xa3   : > { %v629_v55 = vsel %vm611_vm14, %v529_v56, %v628_v52  ;;  %v570_v62 = vrot.slane %v566_v59, 4  ;;  %v576_v63 = vrot.slane %v567_v60, 4  ;;  %v582_v0 = vrot.slane %v568_v61, 4 }
  0xa4   : > { %v630_v1 = vsel %vm613_vm0, %v535_v57, %v629_v55  ;;  %v588_v20 = vrot.slane %v569_v53, 4 }
  0xa5   : > { %v641_v23 = vsel %vm639_vm1, %v622_v45, %v630_v1  ;;  %v571_v2 = vadd.f32 %v570_v62, %v566_v59  ;;  %v577_v24 = vadd.f32 %v576_v63, %v567_v60  ;;  %v583_v4 = vadd.f32 %v582_v0, %v568_v61 }
  0xa6   : > { %v896_v5 = vpack.c.bf16 %v641_v23, %v640_v46  ;;  %v589_v6 = vadd.f32 %v588_v20, %v569_v53 }
  0xa7   : > { %v572_v7 = vrot.slane %v571_v2, 2  ;;  %v578_v8 = vrot.slane %v577_v24, 2  ;;  %v584_v9 = vrot.slane %v583_v4, 2 }
  0xa8   : > { %897 = vmatpush3.bf16.msra.mxu0 %v896_v5  ;;  %v590_v25 = vrot.slane %v589_v6, 2 }
  0xa9   : > { %890 = vmatprep.subr.mxu0 %v1139_v3  ;;  %v573_v10 = vadd.f32 %v572_v7, %v571_v2  ;;  %v579_v11 = vadd.f32 %v578_v8, %v577_v24  ;;  %v585_v12 = vadd.f32 %v584_v9, %v583_v4  ;;  %v642_v3 = vld [vmem:[#allocation2] sm:$0xff] }
  0xaa   : > { %v591_v13 = vadd.f32 %v590_v25, %v589_v6 }
  0xab   : > { %v574_v15 = vrot.slane %v573_v10, 1  ;;  %v580_v16 = vrot.slane %v579_v11, 1  ;;  %v586_v17 = vrot.slane %v585_v12, 1 }
  0xac   : > { %v592_v18 = vrot.slane %v591_v13, 1 }
  0xad   : > { %v575_v21 = vadd.f32 %v574_v15, %v573_v10  ;;  %v581_v22 = vadd.f32 %v580_v16, %v579_v11  ;;  %v587_v26 = vadd.f32 %v586_v17, %v585_v12 }
  0xae   : > { %v593_v27 = vadd.f32 %v592_v18, %v591_v13 }
  0xaf   : > { %v636_v28 = vsel %vm598_vm7, %v581_v22, %v575_v21 }
  0xb0   : > { %v637_v31 = vsel %vm600_vm13, %v587_v26, %v636_v28 }
  0xb1   : > { %v638_v32 = vsel %vm602_vm15, %v593_v27, %v637_v31 }
  0xb2   : > { %891 = vmatpush3.msk.msra.mxu0 %vm639_vm1, %v638_v32 }
  0xb3   : > { %893 = vmatmul.mubr.msk.f32.vlgmr.msra.gmra.mrb[0].mxu0 %vm643_vm2, %v642_v3 }
 0x186   : > { %v715_v54 = vpop.f32.mrb[0].mxu0 }
 0x187   : > { %719 = vst [vmem:[%s281_s7] sm:$0xff] %v715_v54  ;;  %v894_v29 = vpop.f32.mrb[1].mxu0 }
 0x188   : > { %1058 = shalt.err (!%p1055_p13)
}
 0x189   : > { %s1059_s13 = scalar_lea.hbm %s1446_s6, 128  ;;  %s1063_s14 = scalar_lea.hbm %s1497_s4, 256 }
 0x18a   : > { %p1060_p2 = scmp.ne.s32.totalorder %s1446_s6, %s1059_s13  ;;  %p1064_p4 = scmp.lt.u32.totalorder %s1446_s6, %s1497_s4 }
 0x18b   : > { %p1065_p8 = scmp.lt.u32.totalorder %s1063_s14, %s1059_s13  ;;  %p1067_p10 = scmp.lt.u32.totalorder %s1059_s13, %s1446_s6 }
 0x18c   : > { %p1061_p6 = pnand %p1060_p2, %p1518_p11 }
 0x18d   : > { %p1066_p5 = por %p1065_p8, %p1064_p4 }
 0x18e   : > { %p1062_p12 = pneg %p1061_p6 }
 0x18f   : > { %p1068_p1 = por %p1067_p10, %p1066_p5 }
 0x191   : > { %p1069_p0 = pnand %p1068_p1, %p1062_p12 }
 0x193   : > { %1072 = shalt.err (!%p1069_p0)
}
 0x194   : > { %905 = dma.vmem_to_hbm [thread:$0]  (%p1518_p11), %s1441_s22, 128, %s1446_s6, %s721_s25  }
 0x195 PF: > { %s747_s7 = sand.u32 1, %s1111_s15   ;;  %p1519_p9 = scmp.ne.s32.totalorder %s1508_s28, 0 }
 0x196   : > { %p1520_p3 = scmp.ge.s32.totalorder %s1131_s20, 2  ;;  %s748_s23 = scalar_lea.sflag [#allocation4], %s747_s7 }
 0x198   : > { %p916_p7 = pnand %p1520_p3, %p1519_p9 }
 0x19a   : > { %1106 = dma.done.wait (!%p916_p7), %s748_s23, 128  }
 0x19b   : > { %1108 = vsyncadd (!%p916_p7), %s748_s23, 4294967168  ;;  %s21_s20 = sadd.s32 1, %s1131_s20   ;;  %s1521_s15 = smov %s1115_s16 }
 0x19c   : > { %p18_p13 = scmp.ge.s32.totalorder %s21_s20, 4   ;;  %s1522_s16 = smov %s1119_s17 }
 0x19d   : > { %s1523_s17 = smov %s1285_s5  ;;  %s1524_s18 = smov %s1127_s19 }
 0x19e   : > { %s1525_s19 = smov %s1527_s8  ;;  %20 = sbr.rel (!%p18_p13) target bundleno = 7 (0x7), region = 92 }
 0x1a5   :  { %753 = vsyncpa [#allocation3], 1 }
 0x1a6   :  { %755 = vsyncpa [#allocation3 + $0x1], 1 }
 0x1a7   :  { %756 = vsyncpa [#allocation6], 1 }
 0x1a8   :  { %758 = vsyncpa [#allocation6 + $0x1], 1 }
 0x1a9   :  { %759 = vsyncpa [#allocation4], 1 }
 0x1aa   :  { %761 = vsyncpa [#allocation4 + $0x1], 1 }

// kernel: tpu_custom_call.1
= control target key start
LH: loop header
LB: loop body
LE: loop exit
PB: predicated region body
PF: predicated region fallthrough
CT: control target
= control target key end

     0   :  { %9 = vsyncpa [#allocation3], 0  ;;  %s1493_s0 = inlined_call_operand.vmem [shape: f32[3,5,128], index: 0, kind: input, shape index: {}]   ;;  %s1494_s1 = inlined_call_operand.hbm [shape: f32[8,20], index: 1, kind: input, shape index: {}]   ;;  %s1495_s2 = inlined_call_operand.vmem [shape: f32[2,3,8,128], index: 2, kind: input, shape index: {}]   ;;  %s1496_s3 = inlined_call_operand.hbm [shape: f32[2,4,8,128], index: 3, kind: input, shape index: {}]   ;;  %s1497_s4 = inlined_call_operand.hbm [shape: f32[2,8,128], index: 4, kind: output, shape index: {}]  }
   0x1   :  { %10 = vsyncpa [#allocation6], 0 }
   0x2   :  { %12 = vsyncpa [#allocation6 + $0x1], 0 }
   0x3   :  { %13 = vsyncpa [#allocation4], 0 }
   0x4   :  { %15 = vsyncpa [#allocation4 + $0x1], 0  ;;  %s1166_s15 = smov 0   ;;  %s1168_s16 = smov 0  }
   0x5   :  { %s1170_s17 = smov 0   ;;  %s1172_s18 = smov 0  }
   0x6   :  { %s1174_s19 = smov 0   ;;  %s1176_s20 = smov 0  }
   0x7 LB: > { %s861_s21 = sadd.s32 4294967295, %s1131_s20   ;;  %s862_s22 = sadd.s32 4294967294, %s1131_s20   ;;  %s1131_s20 = sphi %s1176_s20, %s21_s20   ;;  %s1127_s19 = sphi %s1174_s19, %s1525_s19   ;;  %s1123_s18 = sphi %s1172_s18, %s1524_s18   ;;  %s1119_s17 = sphi %s1170_s17, %s1523_s17   ;;  %s1115_s16 = sphi %s1168_s16, %s1522_s16   ;;  %s1111_s15 = sphi %s1166_s15, %s1521_s15  }
   0x8   : > { %s117_s23 = sadd.s32 1, %s1119_s17  ;;  %p124_p0 = scmp.ne.s32.totalorder %s1119_s17, %s1115_s16 }
   0x9   : > { %p125_p1 = scmp.eq.s32.totalorder %s1131_s20, 0  ;;  %p130_p2 = scmp.ne.s32.totalorder %s1115_s16, %s1111_s15 }
   0xa   : > { %p1204_p3 = scmp.eq.s32.totalorder %s861_s21, 0  ;;  %p156_p4 = scmp.eq.s32.totalorder %s861_s21, 1 }
   0xb   : > { %p1208_p5 = por %p125_p1, %p124_p0  ;;  %p162_p6 = scmp.eq.s32.totalorder %s862_s22, 1 }
   0xc   : > { %s1504_s24 = scalar_select %p1204_p3, 1, 0 }
   0xd   : > { %p1214_p7 = por %p1204_p3, %p130_p2  ;;  %p1218_p8 = por %p156_p4, %p124_p0 }
   0xe   : > { %p1222_p9 = por %p162_p6, %p130_p2  ;;  %p863_p10 = scmp.ge.s32.totalorder %s1131_s20, 1 }
   0xf   : > { %s1506_s26 = scalar_select %p1214_p7, 1, 0 }
  0x10   : > { %s1507_s27 = scalar_select %p1218_p8, 1, 0 }
  0x11   : > { %s1508_s28 = scalar_select %p1222_p9, 1, 0 }
  0x12   : > { %p169_p11 = scmp.lt.s32.totalorder %s1131_s20, 3  ;;  %s1133_s30 = smov [#allocation2]  }
  0x13   : > { %s189_s5 = sshll.u32 %s1133_s30, 4  ;;  %p920_p1 = scmp.lt.s32.totalorder %s1131_s20, 2  ;;  %s190_s5 = int_to_ptr.vmem [resolvable:$true] %s189_s5 }
  0x14   : > { %p1229_p13 = pnand %p863_p10, %p169_p11  ;;  %s33_s8 = sadd.s32 1, %s1127_s19 }
  0x15   : > { %p1238_p4 = pnand %p920_p1, %p1208_p5  ;;  %p1249_p6 = scmp.ge.s32.totalorder %s33_s8, 2 }
  0x16   : > { %s1509_s29 = scalar_select %p1229_p13, 1, 0 }
  0x17   : > { %p907_p0 = pneg %p1229_p13  ;;  %s211_s10 = sand.u32 1, %s1119_s17  }
  0x18   : > { %s1510_s6 = scalar_select %p1238_p4, 1, 0 }
  0x19   : > { %p1244_p2 = pnand %p907_p0, %p1204_p3  ;;  %s987_s13 = scalar_lea.hbm %s1494_s1, 128 }
  0x1a   : > { %s1512_s9 = scalar_select %p1249_p6, 1, 0 }
  0x1b   : > { %p988_p5 = scmp.ne.s32.totalorder %s1494_s1, %s987_s13  ;;  %p989_p10 = pneg %p1244_p2 }
  0x1c   : > { %p994_p0 = scmp.lt.u32.totalorder %s987_s13, %s1494_s1 }
  0x1d   : > { %p990_p11 = pnand %p989_p10, %p988_p5 }
  0x1f   : > { %p991_p1 = pneg %p990_p11 }
  0x21   : > { %p996_p12 = pnand %p994_p0, %p991_p1 }
  0x23   : > { %999 = shalt.err (!%p996_p12)
}
  0x24   : > { %s1000_s30 = scalar_lea.vmem %s190_s5, 128  ;;  %p1008_p3 = scmp.lt.s32.totalorder %s190_s5, %s190_s5 }
  0x25   : > { %p1001_p9 = scmp.ne.s32.totalorder %s190_s5, %s1000_s30  ;;  %p1009_p13 = scmp.lt.s32.totalorder %s1000_s30, %s1000_s30 }
  0x27   : > { %p1003_p8 = pnand %p1001_p9, %p989_p10  ;;  %p1010_p4 = por %p1009_p13, %p1008_p3 }
  0x29   : > { %p1004_p7 = pneg %p1003_p8 }
  0x2b   : > { %p1011_p6 = pnand %p1010_p4, %p1004_p7 }
  0x2d   : > { %1014 = shalt.err (!%p1011_p6)
}
  0x2e   : > { %910 = dma.hbm_to_vmem [thread:$0]  (!%p1244_p2), %s1494_s1, 128, %s190_s5, [#allocation3]  }
  0x2f   : > { %p1513_p9 = scmp.ne.s32.totalorder %s1512_s9, 0  ;;  %s867_s13 = sshll.u32 %s211_s10, 5 }
  0x30   : > { %s881_s21 = sshll.u32 %s1127_s19, 9  ;;  %s215_s30 = scalar_lea.vmem [#allocation5], %s867_s13 }
  0x31   : > { %s1527_s8 = smov (%p1513_p9, %s33_s8), 0  ;;  %s1280_s25 = scalar_lea.hbm %s1496_s3, %s881_s21 }
  0x32   : > { %s112_s14 = ssub.s32 %s1127_s19, %s1527_s8  ;;  %s223_s11 = sshll.u32 %s215_s30, 4  ;;  %s1287_s11 = int_to_ptr.vmem [resolvable:$true] %s223_s11 }
  0x33   : > { %p115_p3 = scmp.eq.s32.totalorder %s112_s14, 0  ;;  %s1289_s9 = scalar_lea.sflag [#allocation6], %s211_s10 }
  0x34   : > { %s1015_s12 = scalar_lea.hbm %s1280_s25, 512  ;;  %p1514_p8 = scmp.ne.s32.totalorder %s1510_s6, 0 }
  0x35   : > { %s1285_s5 = scalar_select %p115_p3, %s1119_s17, %s117_s23  }
  0x36   : > { %p1016_p7 = scmp.ne.s32.totalorder %s1280_s25, %s1015_s12  ;;  %p1017_p12 = pneg %p1514_p8 }
  0x37   : > { %s1020_s13 = scalar_lea.hbm %s1496_s3, 1024  ;;  %p1021_p2 = scmp.lt.u32.totalorder %s1280_s25, %s1496_s3 }
  0x38   : > { %p1018_p13 = pnand %p1017_p12, %p1016_p7  ;;  %p1022_p6 = scmp.lt.u32.totalorder %s1020_s13, %s1015_s12 }
  0x39   : > { %p1024_p10 = scmp.lt.u32.totalorder %s1015_s12, %s1280_s25 }
  0x3a   : > { %p1019_p4 = pneg %p1018_p13  ;;  %p1023_p5 = por %p1022_p6, %p1021_p2 }
  0x3c   : > { %p1025_p11 = por %p1024_p10, %p1023_p5 }
  0x3e   : > { %p1026_p1 = pnand %p1025_p11, %p1019_p4 }
  0x40   : > { %1029 = shalt.err (!%p1026_p1)
}
  0x41   : > { %s1030_s23 = scalar_lea.vmem %s1287_s11, 512  ;;  %s1134_s10 = smov [#allocation5]  }
  0x42   : > { %p1031_p0 = scmp.ne.s32.totalorder %s1287_s11, %s1030_s23  ;;  %s1035_s30 = sshll.u32 %s1134_s10, 4  ;;  %s1036_s30 = int_to_ptr.vmem [resolvable:$false] %s1035_s30 }
  0x43   : > { %s1037_s14 = scalar_lea.vmem %s1036_s30, 1024  ;;  %p1038_p7 = scmp.lt.s32.totalorder %s1287_s11, %s1036_s30 }
  0x44   : > { %p1033_p9 = pnand %p1031_p0, %p1017_p12  ;;  %p1039_p13 = scmp.lt.s32.totalorder %s1037_s14, %s1030_s23 }
  0x46   : > { %p1034_p3 = pneg %p1033_p9  ;;  %p1040_p2 = por %p1039_p13, %p1038_p7 }
  0x48   : > { %p1041_p6 = pnand %p1040_p2, %p1034_p3 }
  0x4a   : > { %1044 = shalt.err (!%p1041_p6)
}
  0x4b   : > { %s1135_s12 = smov 128   ;;  %s1136_s21 = smov 8  }
  0x4c   : > { %914 = dma.hbm_to_vmem [thread:$0]  (!%p1514_p8), %s1280_s25, 512, %s1287_s11, %s1289_s9, %s1135_s12, %s1135_s12, %s1136_s21  }
  0x4d   : > { %p1515_p12 = scmp.ne.s32.totalorder %s1509_s29, 0 }
  0x4e   : > { %p1516_p4 = scmp.ne.s32.totalorder (!%p1515_p12), %s1504_s24, 0 }
  0x4f   : > { %235 = sbr.rel (%p1515_p12) target bundleno = 405 (0x195), region = 36 }
  0x56   : > { %1098 = dma.done.wait (%p1516_p4), [#allocation3], 128  }
  0x57   : > { %1100 = vsyncadd (%p1516_p4), [#allocation3], 4294967168  ;;  %s1324_s13 = sand.u32 1, %s1115_s16   ;;  %p1517_p8 = scmp.ne.s32.totalorder %s1506_s26, 0 }
  0x58   : > { %s872_s7 = sshll.u32 %s1324_s13, 5  ;;  %s242_s22 = scalar_lea.sflag [#allocation6], %s1324_s13 }
  0x59   : > { %s1328_s23 = scalar_lea.vmem [#allocation5], %s872_s7 }
  0x5a   : > { %1102 = dma.done.wait (%p1517_p8), %s242_s22, 512  }
  0x5b   : > { %1104 = vsyncadd (%p1517_p8), %s242_s22, 4294966784  ;;  %p286_p5 = scmp.lt.s32.totalorder %s1123_s18, 1  ;;  %v304_v0 = vlaneseq  ;;  %v1137_v1 = vmov 0.0|0.0   ;;  %vm1138_vm0 = vmmov 0   ;;  %v1139_v3 = vmov 0.0   ;;  %s873_s21 = sshll.u32 %s1324_s13, 3 }
  0x5c   : > { %895 = vmatprep.subr.bf16.mxu0 %v1137_v1  ;;  %892 = vmatprep.mubr.msk.f32.mxu0 %vm1138_vm0, %v1139_v3  ;;  %v294_v8 = vld [vmem:[%s1493_s0] sm:$0x1f]  ;;  %v295_v9 = vld [vmem:[%s1493_s0 + $0x8] sm:$0x1f]  ;;  %v296_v10 = vld [vmem:[%s1493_s0 + $0x10] sm:$0x1f] }
  0x5d   : > { %s287_s24 = scalar_select %p286_p5, %s1123_s18, 1  ;;  %v305_v2 = vshrl.u32 %v304_v0, 7  ;;  %vm598_vm7 = vcmask 1041409   ;;  %vm609_vm8 = vcmask 1045509   ;;  %vm600_vm13 = vcmask 1042434  }
  0x5e   : > { %vm611_vm14 = vcmask 1046534   ;;  %vm602_vm15 = vcmask 1043459   ;;  %vm613_vm0 = vcmask 1047559   ;;  %s281_s7 = scalar_lea.vmem [#allocation7], %s873_s21  ;;  %s721_s25 = scalar_lea.sflag [#allocation4], %s1324_s13 }
  0x5f   : > { %s898_s29 = smul.u32 24, %s287_s24  ;;  %v306_v4 = vsub.s32 0, %v305_v2  ;;  %v364_v5 = vsub.s32 1, %v305_v2  ;;  %v422_v6 = vsub.s32 2, %v305_v2  ;;  %v480_v7 = vsub.s32 3, %v305_v2  ;;  %s735_s22 = sshll.u32 %s281_s7, 4  ;;  %s1441_s22 = int_to_ptr.vmem [resolvable:$true] %s735_s22 }
  0x60   : > { %v538_v36 = vsub.s32 4, %v305_v2  ;;  %p1518_p11 = scmp.ne.s32.totalorder %s1507_s27, 0 }
  0x61   : > { %s293_s26 = scalar_lea.vmem %s1495_s2, %s898_s29  ;;  %v307_v14 = vrot.slane %v294_v8, %v306_v4  ;;  %v313_v15 = vrot.slane %v295_v9, %v306_v4  ;;  %v320_v16 = vrot.slane %v296_v10, %v306_v4  ;;  %v365_v17 = vrot.slane %v294_v8, %v364_v5 }
  0x62   : > { %v297_v11 = vld [vmem:[%s293_s26] sm:$0xff]  ;;  %v298_v12 = vld [vmem:[%s293_s26 + $0x8] sm:$0xff]  ;;  %v299_v13 = vld [vmem:[%s293_s26 + $0x10] sm:$0xff]  ;;  %v371_v18 = vrot.slane %v295_v9, %v364_v5  ;;  %v378_v19 = vrot.slane %v296_v10, %v364_v5  ;;  %v423_v20 = vrot.slane %v294_v8, %v422_v6  ;;  %v429_v21 = vrot.slane %v295_v9, %v422_v6  ;;  %s1045_s26 = scalar_lea.vmem %s1441_s22, 128 }
  0x63   : > { %v308_v22 = vsub.f32 %v307_v14, %v297_v11  ;;  %v314_v23 = vsub.f32 %v313_v15, %v298_v12  ;;  %v321_v24 = vsub.f32 %v320_v16, %v299_v13  ;;  %v366_v25 = vsub.f32 %v365_v17, %v297_v11  ;;  %p1046_p10 = scmp.ne.s32.totalorder %s1441_s22, %s1045_s26 }
  0x64   : > { %v372_v26 = vsub.f32 %v371_v18, %v298_v12  ;;  %v379_v27 = vsub.f32 %v378_v19, %v299_v13  ;;  %v424_v28 = vsub.f32 %v423_v20, %v297_v11  ;;  %v430_v29 = vsub.f32 %v429_v21, %v298_v12  ;;  %v1357_v20 = vld [vmem:[%s1328_s23] sm:$0xff] }
  0x65   : > { %v309_v30 = vmul.f32 %v308_v22, %v308_v22  ;;  %v315_v31 = vmul.f32 %v314_v23, %v314_v23  ;;  %v322_v32 = vmul.f32 %v321_v24, %v321_v24  ;;  %v367_v33 = vmul.f32 %v366_v25, %v366_v25  ;;  %v1362_v23 = vld [vmem:[%s1328_s23 + $0x8] sm:$0xff]  ;;  %v1365_v24 = vld [vmem:[%s1328_s23 + $0x10] sm:$0xff]  ;;  %v1368_v25 = vld [vmem:[%s1328_s23 + $0x18] sm:$0xff]  ;;  %s878_s23 = sshll.u32 %s1123_s18, 7  ;;  %p1047_p1 = pnand %p1046_p10, %p1518_p11 }
  0x66   : > { %v373_v34 = vmul.f32 %v372_v26, %v372_v26  ;;  %v380_v35 = vmul.f32 %v379_v27, %v379_v27  ;;  %v425_v38 = vmul.f32 %v424_v28, %v424_v28  ;;  %v431_v39 = vmul.f32 %v430_v29, %v430_v29  ;;  %s1446_s6 = scalar_lea.hbm %s1497_s4, %s878_s23  ;;  %s1140_s18 = smov [#allocation7]  }
  0x67   : > { %v316_v37 = vadd.f32 %v315_v31, %v309_v30  ;;  %v436_v40 = vrot.slane %v296_v10, %v422_v6  ;;  %v481_v44 = vrot.slane %v294_v8, %v480_v7  ;;  %v487_v45 = vrot.slane %v295_v9, %v480_v7  ;;  %p1048_p0 = pneg %p1047_p1  ;;  %s1049_s11 = sshll.u32 %s1140_s18, 4  ;;  %s1050_s11 = int_to_ptr.vmem [resolvable:$false] %s1049_s11 }
  0x68   : > { %v374_v41 = vadd.f32 %v373_v34, %v367_v33  ;;  %v432_v47 = vadd.f32 %v431_v39, %v425_v38  ;;  %v539_v48 = vrot.slane %v294_v8, %v538_v36  ;;  %v545_v49 = vrot.slane %v295_v9, %v538_v36  ;;  %s1051_s9 = scalar_lea.vmem %s1050_s11, 256  ;;  %p1052_p9 = scmp.lt.s32.totalorder %s1441_s22, %s1050_s11 }
  0x69   : > { %v323_v42 = vadd.f32 %v322_v32, %v316_v37  ;;  %v437_v43 = vsub.f32 %v436_v40, %v299_v13  ;;  %v482_v51 = vsub.f32 %v481_v44, %v297_v11  ;;  %v488_v52 = vsub.f32 %v487_v45, %v298_v12  ;;  %p1053_p3 = scmp.lt.s32.totalorder %s1051_s9, %s1045_s26 }
  0x6a   : > { %v381_v46 = vadd.f32 %v380_v35, %v374_v41  ;;  %v494_v53 = vrot.slane %v296_v10, %v480_v7  ;;  %v540_v55 = vsub.f32 %v539_v48, %v297_v11  ;;  %v546_v56 = vsub.f32 %v545_v49, %v298_v12 }
  0x6b   : > { %977 = vrsqrt.f32 %v323_v42  ;;  %v438_v50 = vmul.f32 %v437_v43, %v437_v43  ;;  %v552_v57 = vrot.slane %v296_v10, %v538_v36  ;;  %v483_v58 = vmul.f32 %v482_v51, %v482_v51  ;;  %p1054_p7 = por %p1053_p3, %p1052_p9 }
  0x6c   : > { %979 = vrsqrt.f32 %v381_v46  ;;  %v489_v59 = vmul.f32 %v488_v52, %v488_v52  ;;  %v495_v60 = vsub.f32 %v494_v53, %v299_v13  ;;  %v541_v61 = vmul.f32 %v540_v55, %v540_v55 }
  0x6d   : > { %v1349_v54 = vadd.f32 %v438_v50, %v432_v47  ;;  %v547_v62 = vmul.f32 %v546_v56, %v546_v56  ;;  %v553_v63 = vsub.f32 %v552_v57, %v299_v13  ;;  %vm326_vm1 = vcmp.eq.f32.partialorder %v323_v42, inf  ;;  %p1055_p13 = pnand %p1054_p7, %p1048_p0 }
  0x6e   : > { %v329_v1 = vand.u32 2147483648, %v323_v42  ;;  %v490_v2 = vadd.f32 %v489_v59, %v483_v58  ;;  %v496_v4 = vmul.f32 %v495_v60, %v495_v60  ;;  %vm328_vm2 = vcmp.eq.f32.partialorder %v323_v42, 0.0 }
  0x6f   : > { %981 = vrsqrt.f32 %v1349_v54  ;;  %vm384_vm3 = vcmp.eq.f32.partialorder %v381_v46, inf  ;;  %v387_v7 = vand.u32 2147483648, %v381_v46  ;;  %vm386_vm4 = vcmp.eq.f32.partialorder %v381_v46, 0.0 }
  0x70   : > { %v548_v9 = vadd.f32 %v547_v62, %v541_v61  ;;  %v554_v10 = vmul.f32 %v553_v63, %v553_v63  ;;  %v1352_v14 = vadd.f32 %v496_v4, %v490_v2  ;;  %vm442_vm5 = vcmp.eq.f32.partialorder %v1349_v54, inf }
  0x71   : > { %vm444_vm6 = vcmp.eq.f32.partialorder %v1349_v54, 0.0  ;;  %v445_v30 = vand.u32 2147483648, %v1349_v54 }
  0x72   : > { %v1354_v19 = vadd.f32 %v554_v10, %v548_v9  ;;  %983 = vrsqrt.f32 %v1352_v14  ;;  %vm500_vm9 = vcmp.eq.f32.partialorder %v1352_v14, inf  ;;  %v503_v9 = vand.u32 2147483648, %v1352_v14 }
  0x73   : > { %vm502_vm10 = vcmp.eq.f32.partialorder %v1352_v14, 0.0 }
  0x74   : > { %985 = vrsqrt.f32 %v1354_v19  ;;  %vm558_vm11 = vcmp.eq.f32.partialorder %v1354_v19, inf  ;;  %vm560_vm12 = vcmp.eq.f32.partialorder %v1354_v19, 0.0 }
  0x75   : > { %v978_v0 = vpop.eup %977 }
  0x76   : > { %v980_v5 = vpop.eup %979  ;;  %v325_v6 = vmul.f32 %v978_v0, %v323_v42 }
  0x77   : > { %v383_v8 = vmul.f32 %v980_v5, %v381_v46 }
  0x78   : > { %v327_v11 = vsel %vm326_vm1, %v323_v42, %v325_v6  ;;  %vm639_vm1 = vcmask 1043456  }
  0x79   : > { %v330_v12 = vsel %vm328_vm2, %v329_v1, %v327_v11  ;;  %v385_v13 = vsel %vm384_vm3, %v381_v46, %v383_v8  ;;  %v982_v17 = vpop.eup %981  ;;  %vm643_vm2 = vcmask 162816  }
  0x7a   : > { %v331_v15 = vmul.f32 1.6666666, %v330_v12  ;;  %v388_v16 = vsel %vm386_vm4, %v387_v7, %v385_v13  ;;  %v441_v22 = vmul.f32 %v982_v17, %v1349_v54 }
  0x7b   : > { %v389_v18 = vmul.f32 1.6666666, %v388_v16 }
  0x7c   : > { %v332_v21 = vsub.f32 1.0, %v331_v15  ;;  %v443_v29 = vsel %vm442_vm5, %v1349_v54, %v441_v22  ;;  %v984_v60 = vpop.eup %983  ;;  %v561_v22 = vand.u32 2147483648, %v1354_v19 }
  0x7d   : > { %v390_v26 = vsub.f32 1.0, %v389_v18  ;;  %v446_v12 = vsel %vm444_vm6, %v445_v30, %v443_v29  ;;  %v499_v13 = vmul.f32 %v984_v60, %v1352_v14 }
  0x7e   : > { %v333_v27 = vmax.f32 %v332_v21, 0.0  ;;  %v986_v5 = vpop.eup %985  ;;  %v447_v54 = vmul.f32 1.6666666, %v446_v12 }
  0x7f   : > { %v391_v28 = vmax.f32 %v390_v26, 0.0  ;;  %v501_v29 = vsel %vm500_vm9, %v1352_v14, %v499_v13  ;;  %v557_v30 = vmul.f32 %v986_v5, %v1354_v19 }
  0x80   : > { %v334_v31 = vmul.f32 %v333_v27, %v1357_v20  ;;  %v335_v32 = vmul.f32 %v333_v27, %v1362_v23  ;;  %v336_v33 = vmul.f32 %v333_v27, %v1365_v24  ;;  %v337_v34 = vmul.f32 %v333_v27, %v1368_v25 }
  0x81   : > { %v392_v35 = vmul.f32 %v391_v28, %v1357_v20  ;;  %v393_v36 = vmul.f32 %v391_v28, %v1362_v23  ;;  %v394_v37 = vmul.f32 %v391_v28, %v1365_v24  ;;  %v395_v38 = vmul.f32 %v391_v28, %v1368_v25 }
  0x82   : > { %v338_v39 = vrot.slane %v334_v31, 4  ;;  %v344_v40 = vrot.slane %v335_v32, 4  ;;  %v350_v41 = vrot.slane %v336_v33, 4  ;;  %v356_v42 = vrot.slane %v337_v34, 4 }
  0x83   : > { %v396_v43 = vrot.slane %v392_v35, 4  ;;  %v402_v44 = vrot.slane %v393_v36, 4  ;;  %v408_v45 = vrot.slane %v394_v37, 4  ;;  %v414_v46 = vrot.slane %v395_v38, 4 }
  0x84   : > { %v339_v47 = vadd.f32 %v338_v39, %v334_v31  ;;  %v345_v48 = vadd.f32 %v344_v40, %v335_v32  ;;  %v351_v49 = vadd.f32 %v350_v41, %v336_v33  ;;  %v357_v50 = vadd.f32 %v356_v42, %v337_v34 }
  0x85   : > { %v397_v51 = vadd.f32 %v396_v43, %v392_v35  ;;  %v403_v52 = vadd.f32 %v402_v44, %v393_v36  ;;  %v409_v53 = vadd.f32 %v408_v45, %v394_v37  ;;  %v415_v55 = vadd.f32 %v414_v46, %v395_v38 }
  0x86   : > { %v340_v56 = vrot.slane %v339_v47, 2  ;;  %v346_v57 = vrot.slane %v345_v48, 2  ;;  %v352_v58 = vrot.slane %v351_v49, 2  ;;  %v358_v59 = vrot.slane %v357_v50, 2 }
  0x87   : > { %v398_v61 = vrot.slane %v397_v51, 2  ;;  %v404_v62 = vrot.slane %v403_v52, 2  ;;  %v410_v63 = vrot.slane %v409_v53, 2  ;;  %v416_v0 = vrot.slane %v415_v55, 2 }
  0x88   : > { %v341_v1 = vadd.f32 %v340_v56, %v339_v47  ;;  %v347_v2 = vadd.f32 %v346_v57, %v345_v48  ;;  %v353_v4 = vadd.f32 %v352_v58, %v351_v49  ;;  %v359_v15 = vadd.f32 %v358_v59, %v357_v50 }
  0x89   : > { %v399_v6 = vadd.f32 %v398_v61, %v397_v51  ;;  %v405_v7 = vadd.f32 %v404_v62, %v403_v52  ;;  %v411_v8 = vadd.f32 %v410_v63, %v409_v53  ;;  %v417_v18 = vadd.f32 %v416_v0, %v415_v55 }
  0x8a   : > { %v342_v10 = vrot.slane %v341_v1, 1  ;;  %v348_v11 = vrot.slane %v347_v2, 1  ;;  %v354_v21 = vrot.slane %v353_v4, 1  ;;  %v360_v33 = vrot.slane %v359_v15, 1 }
  0x8b   : > { %v400_v16 = vrot.slane %v399_v6, 1  ;;  %v406_v17 = vrot.slane %v405_v7, 1  ;;  %v412_v31 = vrot.slane %v411_v8, 1  ;;  %v418_v34 = vrot.slane %v417_v18, 1 }
  0x8c   : > { %v343_v26 = vadd.f32 %v342_v10, %v341_v1  ;;  %v349_v27 = vadd.f32 %v348_v11, %v347_v2  ;;  %v504_v35 = vsel %vm502_vm10, %v503_v9, %v501_v29  ;;  %v448_v36 = vsub.f32 1.0, %v447_v54 }
  0x8d   : > { %v401_v28 = vadd.f32 %v400_v16, %v399_v6  ;;  %v407_v32 = vadd.f32 %v406_v17, %v405_v7  ;;  %v505_v37 = vmul.f32 1.6666666, %v504_v35  ;;  %v355_v38 = vadd.f32 %v354_v21, %v353_v4 }
  0x8e   : > { %v413_v39 = vadd.f32 %v412_v31, %v411_v8  ;;  %v599_v40 = vsel %vm598_vm7, %v349_v27, %v343_v26  ;;  %v559_v41 = vsel %vm558_vm11, %v1354_v19, %v557_v30  ;;  %v449_v14 = vmax.f32 %v448_v36, 0.0 }
  0x8f   : > { %v506_v42 = vsub.f32 1.0, %v505_v37  ;;  %v610_v43 = vsel %vm609_vm8, %v407_v32, %v401_v28  ;;  %v562_v44 = vsel %vm560_vm12, %v561_v22, %v559_v41  ;;  %v1401_v45 = vadd.f32 %v360_v33, %v359_v15 }
  0x90   : > { %v1403_v46 = vadd.f32 %v418_v34, %v417_v18  ;;  %v1405_v47 = vmul.f32 1.6666666, %v562_v44  ;;  %v450_v48 = vmul.f32 %v449_v14, %v1357_v20  ;;  %v451_v49 = vmul.f32 %v449_v14, %v1362_v23 }
  0x91   : > { %v452_v50 = vmul.f32 %v449_v14, %v1365_v24  ;;  %v453_v51 = vmul.f32 %v449_v14, %v1368_v25  ;;  %v507_v19 = vmax.f32 %v506_v42, 0.0  ;;  %v601_v52 = vsel %vm600_vm13, %v355_v38, %v599_v40 }
  0x92   : > { %v612_v53 = vsel %vm611_vm14, %v413_v39, %v610_v43  ;;  %v564_v55 = vsub.f32 1.0, %v1405_v47  ;;  %v454_v56 = vrot.slane %v450_v48, 4  ;;  %v460_v57 = vrot.slane %v451_v49, 4 }
  0x93   : > { %v466_v58 = vrot.slane %v452_v50, 4  ;;  %v472_v59 = vrot.slane %v453_v51, 4  ;;  %v508_v60 = vmul.f32 %v507_v19, %v1357_v20  ;;  %v509_v61 = vmul.f32 %v507_v19, %v1362_v23 }
  0x94   : > { %v510_v62 = vmul.f32 %v507_v19, %v1365_v24  ;;  %v511_v63 = vmul.f32 %v507_v19, %v1368_v25  ;;  %v455_v0 = vadd.f32 %v454_v56, %v450_v48  ;;  %v461_v1 = vadd.f32 %v460_v57, %v451_v49 }
  0x95   : > { %v467_v2 = vadd.f32 %v466_v58, %v452_v50  ;;  %v473_v4 = vadd.f32 %v472_v59, %v453_v51  ;;  %v512_v5 = vrot.slane %v508_v60, 4  ;;  %v518_v6 = vrot.slane %v509_v61, 4 }
  0x96   : > { %v524_v7 = vrot.slane %v510_v62, 4  ;;  %v530_v8 = vrot.slane %v511_v63, 4  ;;  %v456_v9 = vrot.slane %v455_v0, 2  ;;  %v462_v10 = vrot.slane %v461_v1, 2 }
  0x97   : > { %v468_v11 = vrot.slane %v467_v2, 2  ;;  %v474_v12 = vrot.slane %v473_v4, 2  ;;  %v513_v13 = vadd.f32 %v512_v5, %v508_v60  ;;  %v519_v15 = vadd.f32 %v518_v6, %v509_v61 }
  0x98   : > { %v525_v16 = vadd.f32 %v524_v7, %v510_v62  ;;  %v531_v17 = vadd.f32 %v530_v8, %v511_v63  ;;  %v457_v18 = vadd.f32 %v456_v9, %v455_v0  ;;  %v463_v21 = vadd.f32 %v462_v10, %v461_v1 }
  0x99   : > { %v469_v22 = vadd.f32 %v468_v11, %v467_v2  ;;  %v475_v26 = vadd.f32 %v474_v12, %v473_v4  ;;  %v514_v27 = vrot.slane %v513_v13, 2  ;;  %v520_v28 = vrot.slane %v519_v15, 2 }
  0x9a   : > { %v526_v31 = vrot.slane %v525_v16, 2  ;;  %v532_v32 = vrot.slane %v531_v17, 2  ;;  %v458_v54 = vrot.slane %v457_v18, 1  ;;  %v464_v29 = vrot.slane %v463_v21, 1 }
  0x9b   : > { %v470_v30 = vrot.slane %v469_v22, 1  ;;  %v476_v33 = vrot.slane %v475_v26, 1  ;;  %v515_v34 = vadd.f32 %v514_v27, %v513_v13  ;;  %v521_v35 = vadd.f32 %v520_v28, %v519_v15 }
  0x9c   : > { %v527_v36 = vadd.f32 %v526_v31, %v525_v16  ;;  %v533_v37 = vadd.f32 %v532_v32, %v531_v17  ;;  %v459_v38 = vadd.f32 %v458_v54, %v457_v18  ;;  %v465_v39 = vadd.f32 %v464_v29, %v463_v21 }
  0x9d   : > { %v471_v40 = vadd.f32 %v470_v30, %v469_v22  ;;  %v477_v41 = vadd.f32 %v476_v33, %v475_v26  ;;  %v516_v14 = vrot.slane %v515_v34, 1  ;;  %v522_v42 = vrot.slane %v521_v35, 1 }
  0x9e   : > { %v528_v43 = vrot.slane %v527_v36, 1  ;;  %v534_v44 = vrot.slane %v533_v37, 1  ;;  %v603_v47 = vsel %vm602_vm15, %v1401_v45, %v601_v52  ;;  %v614_v48 = vsel %vm613_vm0, %v1403_v46, %v612_v53 }
  0x9f   : > { %v620_v49 = vsel %vm598_vm7, %v465_v39, %v459_v38  ;;  %v565_v50 = vmax.f32 %v564_v55, 0.0  ;;  %v517_v51 = vadd.f32 %v516_v14, %v515_v34  ;;  %v523_v19 = vadd.f32 %v522_v42, %v521_v35 }
  0xa0   : > { %v529_v56 = vadd.f32 %v528_v43, %v527_v36  ;;  %v535_v57 = vadd.f32 %v534_v44, %v533_v37  ;;  %v621_v58 = vsel %vm600_vm13, %v471_v40, %v620_v49  ;;  %v640_v46 = vsel %vm639_vm1, %v603_v47, %v614_v48 }
  0xa1   : > { %v566_v59 = vmul.f32 %v565_v50, %v1357_v20  ;;  %v567_v60 = vmul.f32 %v565_v50, %v1362_v23  ;;  %v568_v61 = vmul.f32 %v565_v50, %v1365_v24  ;;  %v622_v45 = vsel %vm602_vm15, %v477_v41, %v621_v58 }
  0xa2   : > { %v628_v52 = vsel %vm609_vm8, %v523_v19, %v517_v51  ;;  %v569_v53 = vmul.f32 %v565_v50, %v1368_v25 }
  0xa3   : > { %v629_v55 = vsel %vm611_vm14, %v529_v56, %v628_v52  ;;  %v570_v62 = vrot.slane %v566_v59, 4  ;;  %v576_v63 = vrot.slane %v567_v60, 4  ;;  %v582_v0 = vrot.slane %v568_v61, 4 }
  0xa4   : > { %v630_v1 = vsel %vm613_vm0, %v535_v57, %v629_v55  ;;  %v588_v20 = vrot.slane %v569_v53, 4 }
  0xa5   : > { %v641_v23 = vsel %vm639_vm1, %v622_v45, %v630_v1  ;;  %v571_v2 = vadd.f32 %v570_v62, %v566_v59  ;;  %v577_v24 = vadd.f32 %v576_v63, %v567_v60  ;;  %v583_v4 = vadd.f32 %v582_v0, %v568_v61 }
  0xa6   : > { %v896_v5 = vpack.c.bf16 %v641_v23, %v640_v46  ;;  %v589_v6 = vadd.f32 %v588_v20, %v569_v53 }
  0xa7   : > { %v572_v7 = vrot.slane %v571_v2, 2  ;;  %v578_v8 = vrot.slane %v577_v24, 2  ;;  %v584_v9 = vrot.slane %v583_v4, 2 }
  0xa8   : > { %897 = vmatpush3.bf16.msra.mxu0 %v896_v5  ;;  %v590_v25 = vrot.slane %v589_v6, 2 }
  0xa9   : > { %890 = vmatprep.subr.mxu0 %v1139_v3  ;;  %v573_v10 = vadd.f32 %v572_v7, %v571_v2  ;;  %v579_v11 = vadd.f32 %v578_v8, %v577_v24  ;;  %v585_v12 = vadd.f32 %v584_v9, %v583_v4  ;;  %v642_v3 = vld [vmem:[#allocation2] sm:$0xff] }
  0xaa   : > { %v591_v13 = vadd.f32 %v590_v25, %v589_v6 }
  0xab   : > { %v574_v15 = vrot.slane %v573_v10, 1  ;;  %v580_v16 = vrot.slane %v579_v11, 1  ;;  %v586_v17 = vrot.slane %v585_v12, 1 }
  0xac   : > { %v592_v18 = vrot.slane %v591_v13, 1 }
  0xad   : > { %v575_v21 = vadd.f32 %v574_v15, %v573_v10  ;;  %v581_v22 = vadd.f32 %v580_v16, %v579_v11  ;;  %v587_v26 = vadd.f32 %v586_v17, %v585_v12 }
  0xae   : > { %v593_v27 = vadd.f32 %v592_v18, %v591_v13 }
  0xaf   : > { %v636_v28 = vsel %vm598_vm7, %v581_v22, %v575_v21 }
  0xb0   : > { %v637_v31 = vsel %vm600_vm13, %v587_v26, %v636_v28 }
  0xb1   : > { %v638_v32 = vsel %vm602_vm15, %v593_v27, %v637_v31 }
  0xb2   : > { %891 = vmatpush3.msk.msra.mxu0 %vm639_vm1, %v638_v32 }
  0xb3   : > { %893 = vmatmul.mubr.msk.f32.vlgmr.msra.gmra.mrb[0].mxu0 %vm643_vm2, %v642_v3 }
 0x186   : > { %v715_v54 = vpop.f32.mrb[0].mxu0 }
 0x187   : > { %719 = vst [vmem:[%s281_s7] sm:$0xff] %v715_v54  ;;  %v894_v29 = vpop.f32.mrb[1].mxu0 }
 0x188   : > { %1058 = shalt.err (!%p1055_p13)
}
 0x189   : > { %s1059_s13 = scalar_lea.hbm %s1446_s6, 128  ;;  %s1063_s14 = scalar_lea.hbm %s1497_s4, 256 }
 0x18a   : > { %p1060_p2 = scmp.ne.s32.totalorder %s1446_s6, %s1059_s13  ;;  %p1064_p4 = scmp.lt.u32.totalorder %s1446_s6, %s1497_s4 }
 0x18b   : > { %p1065_p8 = scmp.lt.u32.totalorder %s1063_s14, %s1059_s13  ;;  %p1067_p10 = scmp.lt.u32.totalorder %s1059_s13, %s1446_s6 }
 0x18c   : > { %p1061_p6 = pnand %p1060_p2, %p1518_p11 }
 0x18d   : > { %p1066_p5 = por %p1065_p8, %p1064_p4 }
 0x18e   : > { %p1062_p12 = pneg %p1061_p6 }
 0x18f   : > { %p1068_p1 = por %p1067_p10, %p1066_p5 }
 0x191   : > { %p1069_p0 = pnand %p1068_p1, %p1062_p12 }
 0x193   : > { %1072 = shalt.err (!%p1069_p0)
}
 0x194   : > { %905 = dma.vmem_to_hbm [thread:$0]  (%p1518_p11), %s1441_s22, 128, %s1446_s6, %s721_s25  }
 0x195 PF: > { %s747_s7 = sand.u32 1, %s1111_s15   ;;  %p1519_p9 = scmp.ne.s32.totalorder %s1508_s28, 0 }
 0x196   : > { %p1520_p3 = scmp.ge.s32.totalorder %s1131_s20, 2  ;;  %s748_s23 = scalar_lea.sflag [#allocation4], %s747_s7 }
 0x198   : > { %p916_p7 = pnand %p1520_p3, %p1519_p9 }
 0x19a   : > { %1106 = dma.done.wait (!%p916_p7), %s748_s23, 128  }
 0x19b   : > { %1108 = vsyncadd (!%p916_p7), %s748_s23, 4294967168  ;;  %s21_s20 = sadd.s32 1, %s1131_s20   ;;  %s1521_s15 = smov %s1115_s16 }
 0x19c   : > { %p18_p13 = scmp.ge.s32.totalorder %s21_s20, 4   ;;  %s1522_s16 = smov %s1119_s17 }
 0x19d   : > { %s1523_s17 = smov %s1285_s5  ;;  %s1524_s18 = smov %s1127_s19 }
 0x19e   : > { %s1525_s19 = smov %s1527_s8  ;;  %20 = sbr.rel (!%p18_p13) target bundleno = 7 (0x7), region = 92 }
 0x1a5   :  { %753 = vsyncpa [#allocation3], 1 }
 0x1a6   :  { %755 = vsyncpa [#allocation3 + $0x1], 1 }
 0x1a7   :  { %756 = vsyncpa [#allocation6], 1 }
 0x1a8   :  { %758 = vsyncpa [#allocation6 + $0x1], 1 }
 0x1a9   :  { %759 = vsyncpa [#allocation4], 1 }
 0x1aa   :  { %761 = vsyncpa [#allocation4 + $0x1], 1 }

</bundles_post_ra>
